<compile_context>
chip_gen: v7x
topology: tpu7x:2x2x1
jax: 0.10.0
libtpu: 0.0.40
codegen_flags: <defaults>
</compile_context>

<pallas_src>
import functools
import math

import jax
import jax.numpy as jnp
from jax.experimental import pallas as pl
from jax.experimental.pallas import tpu as pltpu

_VMEM_LIMIT = 32 * 1024 * 1024  # safe on v5e/v6e (128 MiB) and v7x (64 MiB)


def _pick_tile(size, target, align):
    """Largest `align`-multiple that divides `size` and is <= target, else full."""
    if size <= target:
        return size
    t = (target // align) * align
    while t >= align:
        if size % t == 0:
            return t
        t -= align
    return size


# ----------------------------- tiled matmul -----------------------------

def _matmul_kernel(x_ref, w_ref, o_ref, acc_ref):
    @pl.when(pl.program_id(2) == 0)
    def _():
        acc_ref[...] = jnp.zeros_like(acc_ref)

    acc_ref[...] += jnp.dot(x_ref[...], w_ref[...],
                            preferred_element_type=jnp.float32)

    @pl.when(pl.program_id(2) == pl.num_programs(2) - 1)
    def _():
        o_ref[...] = acc_ref[...].astype(o_ref.dtype)


def pallas_matmul(x, w, out_dtype=None, tm=256, tn=256, tk=512):
    """x: (M, K), w: (K, N) -> (M, N). bf16 in, f32 accumulate."""
    M, K = x.shape
    K2, N = w.shape
    assert K == K2
    out_dtype = x.dtype if out_dtype is None else out_dtype
    tm = _pick_tile(M, tm, 8)
    tn = _pick_tile(N, tn, 128)
    tk = _pick_tile(K, tk, 128)
    return pl.pallas_call(
        _matmul_kernel,
        out_shape=jax.ShapeDtypeStruct((M, N), out_dtype),
        grid=(M // tm, N // tn, K // tk),
        in_specs=[pl.BlockSpec((tm, tk), lambda i, j, k: (i, k)),
                  pl.BlockSpec((tk, tn), lambda i, j, k: (k, j))],
        out_specs=pl.BlockSpec((tm, tn), lambda i, j, k: (i, j)),
        scratch_shapes=[pltpu.VMEM((tm, tn), jnp.float32)],
        compiler_params=pltpu.CompilerParams(
            dimension_semantics=("parallel", "parallel", "arbitrary"),
            vmem_limit_bytes=_VMEM_LIMIT),
    )(x, w)


# ------------------------------- RMSNorm --------------------------------

def _rmsnorm_kernel(x_ref, w_ref, o_ref, *, eps):
    x = x_ref[...].astype(jnp.float32)                 # (tm, D)
    ms = jnp.mean(x * x, axis=-1, keepdims=True)
    y = x * jax.lax.rsqrt(ms + eps)
    o_ref[...] = (y * w_ref[...].astype(jnp.float32)).astype(o_ref.dtype)


def pallas_rmsnorm(x2d, weight, eps):
    """x2d: (M, D), weight: (D,) -> (M, D), same dtype as x2d."""
    M, D = x2d.shape
    tm = _pick_tile(M, 256, 8)
    return pl.pallas_call(
        functools.partial(_rmsnorm_kernel, eps=eps),
        out_shape=jax.ShapeDtypeStruct((M, D), x2d.dtype),
        grid=(M // tm,),
        in_specs=[pl.BlockSpec((tm, D), lambda i: (i, 0)),
                  pl.BlockSpec((1, D), lambda i: (0, 0))],
        out_specs=pl.BlockSpec((tm, D), lambda i: (i, 0)),
        compiler_params=pltpu.CompilerParams(
            dimension_semantics=("parallel",)),
    )(x2d, weight.reshape(1, D))


# --------------------------- flash GQA attention -------------------------

def _attn_kernel(q_ref, k_ref, v_ref, o_ref, m_ref, l_ref, acc_ref,
                 *, scale, start_pos, s_len, t_blk):
    t = pl.program_id(2)

    @pl.when(t == 0)
    def _():
        m_ref[...] = jnp.full_like(m_ref, -jnp.inf)
        l_ref[...] = jnp.zeros_like(l_ref)
        acc_ref[...] = jnp.zeros_like(acc_ref)

    q = q_ref[0, 0]                                    # (n_rep*S, hd) bf16
    k = k_ref[0, 0]                                    # (t_blk, hd)   bf16
    v = v_ref[0, 0]

    s = jax.lax.dot_general(q, k, (((1,), (1,)), ((), ())),
                            preferred_element_type=jnp.float32) * scale

    # Causal mask generated in-kernel (no dense (S,T) mask DMA'd per step).
    RS, TK = s.shape
    row = jax.lax.broadcasted_iota(jnp.int32, (RS, TK), 0)
    col = jax.lax.broadcasted_iota(jnp.int32, (RS, TK), 1)
    q_pos = start_pos + row % s_len                    # global query position
    k_pos = t * t_blk + col                            # global key position
    s = jnp.where(k_pos <= q_pos, s, -jnp.inf)

    m_prev = m_ref[...]
    m_new = jnp.maximum(m_prev, jnp.max(s, axis=-1, keepdims=True))
    alpha = jnp.exp(m_prev - m_new)
    p = jnp.exp(s - m_new)
    l_ref[...] = alpha * l_ref[...] + jnp.sum(p, axis=-1, keepdims=True)
    acc_ref[...] = alpha * acc_ref[...] + jnp.dot(
        p.astype(v.dtype), v, preferred_element_type=jnp.float32)
    m_ref[...] = m_new

    @pl.when(t == pl.num_programs(2) - 1)
    def _():
        o_ref[0, 0] = (acc_ref[...] *
                       pl.reciprocal(l_ref[...], approx=True)).astype(o_ref.dtype)


def pallas_attention(xq_g, keys, values, start_pos, s_len):
    """xq_g: (B, Hkv, n_rep*S, hd); keys/values: (B, Hkv, T, hd)."""
    B, Hkv, RS, hd = xq_g.shape
    _, _, T, _ = keys.shape
    scale = 1.0 / math.sqrt(hd)
    tkv = _pick_tile(T, 512, 8)
    kernel = functools.partial(_attn_kernel, scale=scale, start_pos=start_pos,
                               s_len=s_len, t_blk=tkv)
    return pl.pallas_call(
        kernel,
        out_shape=jax.ShapeDtypeStruct((B, Hkv, RS, hd), xq_g.dtype),
        grid=(B, Hkv, T // tkv),
        in_specs=[
            pl.BlockSpec((1, 1, RS, hd), lambda b, h, t: (b, h, 0, 0)),
            pl.BlockSpec((1, 1, tkv, hd), lambda b, h, t: (b, h, t, 0)),
            pl.BlockSpec((1, 1, tkv, hd), lambda b, h, t: (b, h, t, 0)),
        ],
        out_specs=pl.BlockSpec((1, 1, RS, hd), lambda b, h, t: (b, h, 0, 0)),
        scratch_shapes=[pltpu.VMEM((RS, 1), jnp.float32),
                        pltpu.VMEM((RS, 1), jnp.float32),
                        pltpu.VMEM((RS, hd), jnp.float32)],
        compiler_params=pltpu.CompilerParams(
            dimension_semantics=("parallel", "parallel", "arbitrary"),
            vmem_limit_bytes=_VMEM_LIMIT),
    )(xq_g, keys, values)


# ------------------------------ SwiGLU FFN -------------------------------

def _ffn_kernel(x_ref, w1_ref, w3_ref, w2_ref, o_ref, acc_ref):
    j = pl.program_id(1)

    @pl.when(j == 0)
    def _():
        acc_ref[...] = jnp.zeros_like(acc_ref)

    x = x_ref[...]                                     # (tm, D) bf16
    h1 = jnp.dot(x, w1_ref[...], preferred_element_type=jnp.float32)
    h3 = jnp.dot(x, w3_ref[...], preferred_element_type=jnp.float32)
    g = (h1 * jax.nn.sigmoid(h1)) * h3                 # silu(w1 x) * (w3 x)
    acc_ref[...] += jnp.dot(g.astype(w2_ref.dtype), w2_ref[...],
                            preferred_element_type=jnp.float32)

    @pl.when(j == pl.num_programs(1) - 1)
    def _():
        o_ref[...] = acc_ref[...].astype(o_ref.dtype)


def pallas_ffn(x2d, w1, w3, w2, tm=256, th=512):
    """x2d: (M, D); w1/w3: (D, H); w2: (H, D). Tiled over M and hidden H."""
    M, D = x2d.shape
    H = w1.shape[1]
    tm = _pick_tile(M, tm, 8)
    th = _pick_tile(H, th, 128)
    return pl.pallas_call(
        _ffn_kernel,
        out_shape=jax.ShapeDtypeStruct((M, D), x2d.dtype),
        grid=(M // tm, H // th),
        in_specs=[pl.BlockSpec((tm, D), lambda i, j: (i, 0)),
                  pl.BlockSpec((D, th), lambda i, j: (0, j)),
                  pl.BlockSpec((D, th), lambda i, j: (0, j)),
                  pl.BlockSpec((th, D), lambda i, j: (j, 0))],
        out_specs=pl.BlockSpec((tm, D), lambda i, j: (i, 0)),
        scratch_shapes=[pltpu.VMEM((tm, D), jnp.float32)],
        compiler_params=pltpu.CompilerParams(
            dimension_semantics=("parallel", "arbitrary"),
            vmem_limit_bytes=_VMEM_LIMIT),
    )(x2d, w1, w3, w2)


# ------------------------------ RoPE (glue) --------------------------------

def apply_scaling(freqs, scale_factor, original):
    low_freq_factor = 1.0
    high_freq_factor = 1.0
    old_context_len = float(original)
    low_freq_wavelen = old_context_len / low_freq_factor
    high_freq_wavelen = old_context_len / high_freq_factor
    wavelen = 2.0 * jnp.pi / freqs
    new_freqs = jnp.where(wavelen > low_freq_wavelen, freqs / scale_factor, freqs)
    denom = high_freq_factor - low_freq_factor
    safe_denom = denom if denom != 0.0 else 1.0   # guard the 0/0 in the reference
    smooth = (old_context_len / wavelen - low_freq_factor) / safe_denom
    return jnp.where(
        (wavelen >= high_freq_wavelen) & (wavelen <= low_freq_wavelen),
        (1.0 - smooth) * new_freqs / scale_factor + smooth * new_freqs,
        new_freqs)


def precompute_rope(dim, end, theta, use_scaled, scale_factor, original):
    freqs = 1.0 / (theta ** (jnp.arange(0, dim, 2)[: dim // 2]
                             .astype(jnp.float32) / dim))
    if use_scaled:
        freqs = apply_scaling(freqs, scale_factor, original)
    t = jnp.arange(end, dtype=jnp.float32)
    angles = jnp.outer(t, freqs)                        # (end, dim//2)
    return jnp.cos(angles), jnp.sin(angles)             # real-valued (no complex64)


def apply_rotary_emb(xq, xk, cos, sin):
    # x: (B, S, H, hd); cos/sin: (S, hd//2).  Pairs (2i, 2i+1) = (real, imag).
    # TODO(synk): could be fused as a VPU epilogue of the QKV matmul kernel.
    def rot(x):
        B, S, H, hd = x.shape
        xf = x.astype(jnp.float32).reshape(B, S, H, hd // 2, 2)
        xe, xo = xf[..., 0], xf[..., 1]
        c = cos.reshape(1, S, 1, hd // 2)
        s = sin.reshape(1, S, 1, hd // 2)
        out = jnp.stack([xe * c - xo * s, xe * s + xo * c], axis=-1)
        return out.reshape(B, S, H, hd).astype(x.dtype)
    return rot(xq), rot(xk)


# --------------------------- model (JAX wrapper) ----------------------------

def attention_forward(p, cache_k, cache_v, x, start_pos, cos, sin, cfg):
    B, S, dim = x.shape
    n_heads = cfg["n_heads"]
    n_kv = cfg["n_kv_heads"]
    hd = dim // n_heads
    n_rep = n_heads // n_kv

    x2 = x.reshape(B * S, dim)
    qkv = pallas_matmul(x2, p["wqkv"])                  # fused Q/K/V projection
    q_end = n_heads * hd
    k_end = q_end + n_kv * hd
    xq = qkv[:, :q_end].reshape(B, S, n_heads, hd)
    xk = qkv[:, q_end:k_end].reshape(B, S, n_kv, hd)
    xv = qkv[:, k_end:].reshape(B, S, n_kv, hd)

    xq, xk = apply_rotary_emb(xq, xk, cos, sin)

    # TODO(synk): update the KV cache in-place via input_output_aliases inside a
    # Pallas kernel instead of a functional dynamic_update_slice round trip.
    cache_k = jax.lax.dynamic_update_slice(cache_k, xk.astype(cache_k.dtype),
                                           (0, start_pos, 0, 0))
    cache_v = jax.lax.dynamic_update_slice(cache_v, xv.astype(cache_v.dtype),
                                           (0, start_pos, 0, 0))
    T = start_pos + S
    keys = jnp.transpose(cache_k[:B, :T], (0, 2, 1, 3))     # (B, Hkv, T, hd)
    values = jnp.transpose(cache_v[:B, :T], (0, 2, 1, 3))

    # Group query heads by their kv head (repeat_interleave semantics: query
    # head h uses kv head h // n_rep) -> (B, Hkv, n_rep*S, hd); K/V are then
    # DMA'd once per kv head instead of n_rep times.
    xq_g = jnp.transpose(xq, (0, 2, 1, 3)).reshape(B, n_kv, n_rep * S, hd)

    out = pallas_attention(xq_g, keys, values, start_pos, S)
    out = out.reshape(B, n_heads, S, hd)
    out = jnp.transpose(out, (0, 2, 1, 3)).reshape(B * S, n_heads * hd)
    attn = pallas_matmul(out, p["wo"]).reshape(B, S, dim)
    return attn, cache_k, cache_v


def transformer_block_forward(p, cache_k, cache_v, x, start_pos, cos, sin, cfg):
    B, S, dim = x.shape
    eps = cfg["norm_eps"]
    xn = pallas_rmsnorm(x.reshape(B * S, dim), p["attention_norm"],
                        eps).reshape(B, S, dim)
    attn, cache_k, cache_v = attention_forward(p, cache_k, cache_v, xn,
                                               start_pos, cos, sin, cfg)
    h = x + attn
    hn = pallas_rmsnorm(h.reshape(B * S, dim), p["ffn_norm"], eps)
    ff = pallas_ffn(hn, p["w1"], p["w3"], p["w2"]).reshape(B, S, dim)
    return h + ff, cache_k, cache_v


def transformer_forward(params, caches, tokens, start_pos, cfg):
    B, S = tokens.shape
    dim = cfg["dim"]
    h = params["tok_embeddings"][tokens]                # (B, S, dim) bf16

    cos = params["rope_cos"][start_pos:start_pos + S]
    sin = params["rope_sin"][start_pos:start_pos + S]

    new_caches = []
    for layer_p, (ck, cv) in zip(params["layers"], caches):
        h, ck, cv = transformer_block_forward(layer_p, ck, cv, h, start_pos,
                                              cos, sin, cfg)
        new_caches.append((ck, cv))

    hn = pallas_rmsnorm(h.reshape(B * S, dim), params["norm"], cfg["norm_eps"])
    # output head weight is tied to tok_embeddings; pre-transposed once at init.
    logits = pallas_matmul(hn, params["output_w"], out_dtype=jnp.float32)
    return logits.reshape(B, S, -1), new_caches


# ------------------------------ init / main ---------------------------------

def init_params(key, cfg):
    dim = cfg["dim"]
    n_heads = cfg["n_heads"]
    n_kv = cfg["n_kv_heads"]
    hd = dim // n_heads
    hidden = cfg["multiple_of"] * (
        (4 * dim + cfg["multiple_of"] - 1) // cfg["multiple_of"])
    scale = 0.02

    n_mats = 1 + cfg["n_layers"] * 7
    keys = jax.random.split(key, n_mats)
    ki = iter(range(n_mats))

    def rnd(shape):
        return (scale * jax.random.normal(keys[next(ki)], shape)
                ).astype(jnp.bfloat16)

    tok = rnd((cfg["vocab_size"], dim))
    params = {
        "tok_embeddings": tok,
        "output_w": tok.T,                     # weight tying, transposed ONCE
        "norm": jnp.ones((dim,), jnp.bfloat16),
        "layers": [],
    }
    for _ in range(cfg["n_layers"]):
        wq = rnd((dim, n_heads * hd))
        wk = rnd((dim, n_kv * hd))
        wv = rnd((dim, n_kv * hd))
        layer = {
            "wqkv": jnp.concatenate([wq, wk, wv], axis=1),   # fused QKV weight
            "wo": rnd((n_heads * hd, dim)),
            "w1": rnd((dim, hidden)),
            "w3": rnd((dim, hidden)),
            "w2": rnd((hidden, dim)),
            "attention_norm": jnp.ones((dim,), jnp.bfloat16),
            "ffn_norm": jnp.ones((dim,), jnp.bfloat16),
        }
        params["layers"].append(layer)

    cos, sin = precompute_rope(
        hd, cfg["cache_len"], cfg["rope_theta"], cfg["use_scaled_rope"],
        cfg["rope_scale_factor"], cfg["original_rotary_embed_len"])
    params["rope_cos"] = cos
    params["rope_sin"] = sin
    return params


def init_caches(cfg):
    n_kv = cfg["n_kv_heads"]
    hd = cfg["dim"] // cfg["n_heads"]
    shape = (cfg["max_batch_size"], cfg["cache_len"], n_kv, hd)
    return [(jnp.zeros(shape, jnp.bfloat16), jnp.zeros(shape, jnp.bfloat16))
            for _ in range(cfg["n_layers"])]


if __name__ == "__main__":
    cfg = dict(
        dim=64,
        n_layers=2,
        n_heads=4,
        n_kv_heads=2,
        vocab_size=96,
        multiple_of=32,
        norm_eps=1e-5,
        rope_theta=500000.0,
        use_scaled_rope=True,
        rope_scale_factor=32.0,
        max_batch_size=2,
        original_rotary_embed_len=2048,
        cache_len=16,
    )

    key = jax.random.PRNGKey(0)
    pkey, tkey = jax.random.split(key)
    params = init_params(pkey, cfg)
    caches = init_caches(cfg)

    batch, seqlen, start_pos = 2, 8, 0
    tokens = jax.random.randint(tkey, (batch, seqlen), 0, cfg["vocab_size"],
                                dtype=jnp.int32)

    @functools.partial(jax.jit, static_argnums=(3,))
    def run(params, caches, tokens, start_pos):
        return transformer_forward(params, caches, tokens, start_pos, cfg)

    logits, caches = run(params, caches, tokens, start_pos)
    logits = jax.block_until_ready(logits)

    assert logits.shape == (batch, seqlen, cfg["vocab_size"])
    assert logits.dtype == jnp.float32
    assert bool(jnp.all(jnp.isfinite(logits)))
    print("KERNEL_OK")
</pallas_src>

<mosaic_0001>
module attributes {stable_mosaic.version = 11 : i64} {
  func.func @_matmul_kernel(%arg0: i32, %arg1: i32, %arg2: i32, %arg3: memref<16x64xbf16, #tpu.memory_space<vmem>>, %arg4: memref<64x128xbf16, #tpu.memory_space<vmem>>, %arg5: memref<16x128xbf16, #tpu.memory_space<vmem>>, %arg6: memref<16x128xf32, #tpu.memory_space<vmem>>) attributes {dimension_semantics = [#tpu.dimension_semantics<parallel>, #tpu.dimension_semantics<parallel>, #tpu.dimension_semantics<arbitrary>], iteration_bounds = array<i64: 1, 1, 1>, scalar_prefetch = 0 : i64, scratch_operands = 1 : i64, tpu.core_type = #tpu.core_type<tc>, window_params = [{transform_indices = @transform_0, window_bounds = array<i64: 16, 64>}, {transform_indices = @transform_1, window_bounds = array<i64: 64, 128>}, {transform_indices = @transform_2, window_bounds = array<i64: 16, 128>}]} {
    %c0_i32 = arith.constant 0 : i32
    %0 = arith.cmpi eq, %arg2, %c0_i32 : i32
    %1 = arith.extui %0 : i1 to i32
    %c0_i32_0 = arith.constant 0 : i32
    %2 = arith.cmpi ne, %1, %c0_i32_0 : i32
    scf.if %2 {
      %cst_10 = arith.constant 0.000000e+00 : f32
      %12 = vector.broadcast %cst_10 : f32 to vector<16x128xf32>
      %c0_11 = arith.constant 0 : index
      %c0_12 = arith.constant 0 : index
      %13 = vector.load %arg6[%c0_11, %c0_12] : memref<16x128xf32, #tpu.memory_space<vmem>>, vector<16x128xf32>
      tpu.vector_store %arg6[%c0_11, %c0_12], %12 {strides = array<i32>} : memref<16x128xf32, #tpu.memory_space<vmem>>, vector<16x128xf32>,
    } else {
    }
    %c0 = arith.constant 0 : index
    %c0_1 = arith.constant 0 : index
    %3 = vector.load %arg6[%c0, %c0_1] : memref<16x128xf32, #tpu.memory_space<vmem>>, vector<16x128xf32>
    %c0_2 = arith.constant 0 : index
    %c0_3 = arith.constant 0 : index
    %4 = vector.load %arg3[%c0_2, %c0_3] : memref<16x64xbf16, #tpu.memory_space<vmem>>, vector<16x64xbf16>
    %c0_4 = arith.constant 0 : index
    %c0_5 = arith.constant 0 : index
    %5 = vector.load %arg4[%c0_4, %c0_5] : memref<64x128xbf16, #tpu.memory_space<vmem>>, vector<64x128xbf16>
    %cst = arith.constant dense<0.000000e+00> : vector<16x128xf32>
    %6 = tpu.matmul %4, %5, %cst {dimension_numbers = #tpu.dot_dimension_numbers<[1], [0], [0], [1], [0, 0, 1, 1], [], []>} : vector<16x64xbf16>, vector<64x128xbf16>, vector<16x128xf32> -> vector<16x128xf32>
    %7 = arith.addf %3, %6 : vector<16x128xf32>
    %c0_6 = arith.constant 0 : index
    %c0_7 = arith.constant 0 : index
    %8 = vector.load %arg6[%c0_6, %c0_7] : memref<16x128xf32, #tpu.memory_space<vmem>>, vector<16x128xf32>
    tpu.vector_store %arg6[%c0_6, %c0_7], %7 {strides = array<i32>} : memref<16x128xf32, #tpu.memory_space<vmem>>, vector<16x128xf32>,
    %c0_i32_8 = arith.constant 0 : i32
    %9 = arith.cmpi eq, %arg2, %c0_i32_8 : i32
    %10 = arith.extui %9 : i1 to i32
    %c0_i32_9 = arith.constant 0 : i32
    %11 = arith.cmpi ne, %10, %c0_i32_9 : i32
    scf.if %11 {
      %c0_10 = arith.constant 0 : index
      %c0_11 = arith.constant 0 : index
      %12 = vector.load %arg6[%c0_10, %c0_11] : memref<16x128xf32, #tpu.memory_space<vmem>>, vector<16x128xf32>
      %13 = arith.truncf %12 : vector<16x128xf32> to vector<16x128xbf16>
      %c0_12 = arith.constant 0 : index
      %c0_13 = arith.constant 0 : index
      %14 = vector.load %arg5[%c0_12, %c0_13] : memref<16x128xbf16, #tpu.memory_space<vmem>>, vector<16x128xbf16>
      tpu.vector_store %arg5[%c0_12, %c0_13], %13 {strides = array<i32>} : memref<16x128xbf16, #tpu.memory_space<vmem>>, vector<16x128xbf16>,
    } else {
    }
    return
  }
  func.func @transform_0(%arg0: i32, %arg1: i32, %arg2: i32) -> (i32, i32) {
    %c0_i32 = arith.constant 0 : i32
    return %arg0, %arg2 : i32, i32
  }
  func.func @transform_1(%arg0: i32, %arg1: i32, %arg2: i32) -> (i32, i32) {
    %c0_i32 = arith.constant 0 : i32
    return %arg2, %arg1 : i32, i32
  }
  func.func @transform_2(%arg0: i32, %arg1: i32, %arg2: i32) -> (i32, i32) {
    %c0_i32 = arith.constant 0 : i32
    return %arg0, %arg1 : i32, i32
  }
}

module attributes {stable_mosaic.version = 11 : i64} {
  func.func @_rmsnorm_kernel(%arg0: i32, %arg1: memref<16x64xbf16, #tpu.memory_space<vmem>>, %arg2: memref<1x64xbf16, #tpu.memory_space<vmem>>, %arg3: memref<16x64xbf16, #tpu.memory_space<vmem>>) attributes {dimension_semantics = [#tpu.dimension_semantics<parallel>], iteration_bounds = array<i64: 1>, scalar_prefetch = 0 : i64, scratch_operands = 0 : i64, tpu.core_type = #tpu.core_type<tc>, window_params = [{transform_indices = @transform_0, window_bounds = array<i64: 16, 64>}, {pipeline_mode = #tpu.pipeline_mode<synchronous>, transform_indices = @transform_1, window_bounds = array<i64: 1, 64>}, {transform_indices = @transform_2, window_bounds = array<i64: 16, 64>}]} {
    %c0 = arith.constant 0 : index
    %c0_0 = arith.constant 0 : index
    %0 = vector.load %arg1[%c0, %c0_0] : memref<16x64xbf16, #tpu.memory_space<vmem>>, vector<16x64xbf16>
    %1 = arith.extf %0 : vector<16x64xbf16> to vector<16x64xf32>
    %2 = arith.mulf %1, %1 : vector<16x64xf32>
    %cst = arith.constant dense<0.000000e+00> : vector<16xf32>
    %3 = vector.multi_reduction <add>, %2, %cst [1] : vector<16x64xf32> to vector<16xf32>
    %4 = vector.shape_cast %3 : vector<16xf32> to vector<16x1xf32>
    %cst_1 = arith.constant 6.400000e+01 : f32
    %5 = vector.broadcast %cst_1 : f32 to vector<16x1xf32>
    %6 = arith.divf %4, %5 : vector<16x1xf32>
    %cst_2 = arith.constant 9.99999974E-6 : f32
    %7 = vector.broadcast %cst_2 : f32 to vector<16x1xf32>
    %8 = arith.addf %6, %7 : vector<16x1xf32>
    %9 = math.rsqrt %8 : vector<16x1xf32>
    %10 = vector.broadcast %9 : vector<16x1xf32> to vector<16x64xf32>
    %11 = arith.mulf %1, %10 : vector<16x64xf32>
    %c0_3 = arith.constant 0 : index
    %c0_4 = arith.constant 0 : index
    %12 = vector.load %arg2[%c0_3, %c0_4] : memref<1x64xbf16, #tpu.memory_space<vmem>>, vector<1x64xbf16>
    %13 = arith.extf %12 : vector<1x64xbf16> to vector<1x64xf32>
    %14 = vector.broadcast %13 : vector<1x64xf32> to vector<16x64xf32>
    %15 = arith.mulf %11, %14 : vector<16x64xf32>
    %16 = arith.truncf %15 : vector<16x64xf32> to vector<16x64xbf16>
    %c0_5 = arith.constant 0 : index
    %c0_6 = arith.constant 0 : index
    %17 = vector.load %arg3[%c0_5, %c0_6] : memref<16x64xbf16, #tpu.memory_space<vmem>>, vector<16x64xbf16>
    tpu.vector_store %arg3[%c0_5, %c0_6], %16 {strides = array<i32>} : memref<16x64xbf16, #tpu.memory_space<vmem>>, vector<16x64xbf16>,
    return
  }
  func.func @transform_0(%arg0: i32) -> (i32, i32) {
    %c0_i32 = arith.constant 0 : i32
    %c0_i32_0 = arith.constant 0 : i32
    return %arg0, %c0_i32 : i32, i32
  }
  func.func @transform_1(%arg0: i32) -> (i32, i32) {
    %c0_i32 = arith.constant 0 : i32
    %c0_i32_0 = arith.constant 0 : i32
    %c0_i32_1 = arith.constant 0 : i32
    return %c0_i32, %c0_i32_0 : i32, i32
  }
  func.func @transform_2(%arg0: i32) -> (i32, i32) {
    %c0_i32 = arith.constant 0 : i32
    %c0_i32_0 = arith.constant 0 : i32
    return %arg0, %c0_i32 : i32, i32
  }
}

module attributes {stable_mosaic.version = 11 : i64} {
  func.func @_matmul_kernel(%arg0: i32, %arg1: i32, %arg2: i32, %arg3: memref<16x64xbf16, #tpu.memory_space<vmem>>, %arg4: memref<64x64xbf16, #tpu.memory_space<vmem>>, %arg5: memref<16x64xbf16, #tpu.memory_space<vmem>>, %arg6: memref<16x64xf32, #tpu.memory_space<vmem>>) attributes {dimension_semantics = [#tpu.dimension_semantics<parallel>, #tpu.dimension_semantics<parallel>, #tpu.dimension_semantics<arbitrary>], iteration_bounds = array<i64: 1, 1, 1>, scalar_prefetch = 0 : i64, scratch_operands = 1 : i64, tpu.core_type = #tpu.core_type<tc>, window_params = [{transform_indices = @transform_0, window_bounds = array<i64: 16, 64>}, {transform_indices = @transform_1, window_bounds = array<i64: 64, 64>}, {transform_indices = @transform_2, window_bounds = array<i64: 16, 64>}]} {
    %c0_i32 = arith.constant 0 : i32
    %0 = arith.cmpi eq, %arg2, %c0_i32 : i32
    %1 = arith.extui %0 : i1 to i32
    %c0_i32_0 = arith.constant 0 : i32
    %2 = arith.cmpi ne, %1, %c0_i32_0 : i32
    scf.if %2 {
      %cst_10 = arith.constant 0.000000e+00 : f32
      %12 = vector.broadcast %cst_10 : f32 to vector<16x64xf32>
      %c0_11 = arith.constant 0 : index
      %c0_12 = arith.constant 0 : index
      %13 = vector.load %arg6[%c0_11, %c0_12] : memref<16x64xf32, #tpu.memory_space<vmem>>, vector<16x64xf32>
      tpu.vector_store %arg6[%c0_11, %c0_12], %12 {strides = array<i32>} : memref<16x64xf32, #tpu.memory_space<vmem>>, vector<16x64xf32>,
    } else {
    }
    %c0 = arith.constant 0 : index
    %c0_1 = arith.constant 0 : index
    %3 = vector.load %arg6[%c0, %c0_1] : memref<16x64xf32, #tpu.memory_space<vmem>>, vector<16x64xf32>
    %c0_2 = arith.constant 0 : index
    %c0_3 = arith.constant 0 : index
    %4 = vector.load %arg3[%c0_2, %c0_3] : memref<16x64xbf16, #tpu.memory_space<vmem>>, vector<16x64xbf16>
    %c0_4 = arith.constant 0 : index
    %c0_5 = arith.constant 0 : index
    %5 = vector.load %arg4[%c0_4, %c0_5] : memref<64x64xbf16, #tpu.memory_space<vmem>>, vector<64x64xbf16>
    %cst = arith.constant dense<0.000000e+00> : vector<16x64xf32>
    %6 = tpu.matmul %4, %5, %cst {dimension_numbers = #tpu.dot_dimension_numbers<[1], [0], [0], [1], [0, 0, 1, 1], [], []>} : vector<16x64xbf16>, vector<64x64xbf16>, vector<16x64xf32> -> vector<16x64xf32>
    %7 = arith.addf %3, %6 : vector<16x64xf32>
    %c0_6 = arith.constant 0 : index
    %c0_7 = arith.constant 0 : index
    %8 = vector.load %arg6[%c0_6, %c0_7] : memref<16x64xf32, #tpu.memory_space<vmem>>, vector<16x64xf32>
    tpu.vector_store %arg6[%c0_6, %c0_7], %7 {strides = array<i32>} : memref<16x64xf32, #tpu.memory_space<vmem>>, vector<16x64xf32>,
    %c0_i32_8 = arith.constant 0 : i32
    %9 = arith.cmpi eq, %arg2, %c0_i32_8 : i32
    %10 = arith.extui %9 : i1 to i32
    %c0_i32_9 = arith.constant 0 : i32
    %11 = arith.cmpi ne, %10, %c0_i32_9 : i32
    scf.if %11 {
      %c0_10 = arith.constant 0 : index
      %c0_11 = arith.constant 0 : index
      %12 = vector.load %arg6[%c0_10, %c0_11] : memref<16x64xf32, #tpu.memory_space<vmem>>, vector<16x64xf32>
      %13 = arith.truncf %12 : vector<16x64xf32> to vector<16x64xbf16>
      %c0_12 = arith.constant 0 : index
      %c0_13 = arith.constant 0 : index
      %14 = vector.load %arg5[%c0_12, %c0_13] : memref<16x64xbf16, #tpu.memory_space<vmem>>, vector<16x64xbf16>
      tpu.vector_store %arg5[%c0_12, %c0_13], %13 {strides = array<i32>} : memref<16x64xbf16, #tpu.memory_space<vmem>>, vector<16x64xbf16>,
    } else {
    }
    return
  }
  func.func @transform_0(%arg0: i32, %arg1: i32, %arg2: i32) -> (i32, i32) {
    %c0_i32 = arith.constant 0 : i32
    return %arg0, %arg2 : i32, i32
  }
  func.func @transform_1(%arg0: i32, %arg1: i32, %arg2: i32) -> (i32, i32) {
    %c0_i32 = arith.constant 0 : i32
    return %arg2, %arg1 : i32, i32
  }
  func.func @transform_2(%arg0: i32, %arg1: i32, %arg2: i32) -> (i32, i32) {
    %c0_i32 = arith.constant 0 : i32
    return %arg0, %arg1 : i32, i32
  }
}

module attributes {stable_mosaic.version = 11 : i64} {
  func.func @_attn_kernel(%arg0: i32, %arg1: i32, %arg2: i32, %arg3: memref<1x1x16x16xbf16, #tpu.memory_space<vmem>>, %arg4: memref<1x1x8x16xbf16, #tpu.memory_space<vmem>>, %arg5: memref<1x1x8x16xbf16, #tpu.memory_space<vmem>>, %arg6: memref<1x1x16x16xbf16, #tpu.memory_space<vmem>>, %arg7: memref<16x1xf32, #tpu.memory_space<vmem>>, %arg8: memref<16x1xf32, #tpu.memory_space<vmem>>, %arg9: memref<16x16xf32, #tpu.memory_space<vmem>>) attributes {dimension_semantics = [#tpu.dimension_semantics<parallel>, #tpu.dimension_semantics<parallel>, #tpu.dimension_semantics<arbitrary>], iteration_bounds = array<i64: 2, 2, 1>, scalar_prefetch = 0 : i64, scratch_operands = 3 : i64, tpu.core_type = #tpu.core_type<tc>, window_params = [{transform_indices = @transform_0, window_bounds = array<i64: 1, 1, 16, 16>}, {transform_indices = @transform_1, window_bounds = array<i64: 1, 1, 8, 16>}, {transform_indices = @transform_2, window_bounds = array<i64: 1, 1, 8, 16>}, {transform_indices = @transform_3, window_bounds = array<i64: 1, 1, 16, 16>}]} {
    %c0_i32 = arith.constant 0 : i32
    %0 = arith.cmpi eq, %arg2, %c0_i32 : i32
    %1 = arith.extui %0 : i1 to i32
    %c0_i32_0 = arith.constant 0 : i32
    %2 = arith.cmpi ne, %1, %c0_i32_0 : i32
    scf.if %2 {
      %cst_37 = arith.constant 0xFF800000 : f32
      %64 = vector.broadcast %cst_37 : f32 to vector<16x1xf32>
      %c0_38 = arith.constant 0 : index
      %c0_39 = arith.constant 0 : index
      %65 = vector.load %arg7[%c0_38, %c0_39] : memref<16x1xf32, #tpu.memory_space<vmem>>, vector<16x1xf32>
      tpu.vector_store %arg7[%c0_38, %c0_39], %64 {strides = array<i32>} : memref<16x1xf32, #tpu.memory_space<vmem>>, vector<16x1xf32>,
      %cst_40 = arith.constant 0.000000e+00 : f32
      %66 = vector.broadcast %cst_40 : f32 to vector<16x1xf32>
      %c0_41 = arith.constant 0 : index
      %c0_42 = arith.constant 0 : index
      %67 = vector.load %arg8[%c0_41, %c0_42] : memref<16x1xf32, #tpu.memory_space<vmem>>, vector<16x1xf32>
      tpu.vector_store %arg8[%c0_41, %c0_42], %66 {strides = array<i32>} : memref<16x1xf32, #tpu.memory_space<vmem>>, vector<16x1xf32>,
      %cst_43 = arith.constant 0.000000e+00 : f32
      %68 = vector.broadcast %cst_43 : f32 to vector<16x16xf32>
      %c0_44 = arith.constant 0 : index
      %c0_45 = arith.constant 0 : index
      %69 = vector.load %arg9[%c0_44, %c0_45] : memref<16x16xf32, #tpu.memory_space<vmem>>, vector<16x16xf32>
      tpu.vector_store %arg9[%c0_44, %c0_45], %68 {strides = array<i32>} : memref<16x16xf32, #tpu.memory_space<vmem>>, vector<16x16xf32>,
    } else {
    }
    %c0 = arith.constant 0 : index
    %c0_1 = arith.constant 0 : index
    %c0_2 = arith.constant 0 : index
    %c0_3 = arith.constant 0 : index
    %3 = vector.load %arg3[%c0, %c0_1, %c0_2, %c0_3] : memref<1x1x16x16xbf16, #tpu.memory_space<vmem>>, vector<1x1x16x16xbf16>
    %4 = vector.shape_cast %3 : vector<1x1x16x16xbf16> to vector<16x16xbf16>
    %c0_4 = arith.constant 0 : index
    %c0_5 = arith.constant 0 : index
    %c0_6 = arith.constant 0 : index
    %c0_7 = arith.constant 0 : index
    %5 = vector.load %arg4[%c0_4, %c0_5, %c0_6, %c0_7] : memref<1x1x8x16xbf16, #tpu.memory_space<vmem>>, vector<1x1x8x16xbf16>
    %6 = vector.shape_cast %5 : vector<1x1x8x16xbf16> to vector<8x16xbf16>
    %c0_8 = arith.constant 0 : index
    %c0_9 = arith.constant 0 : index
    %c0_10 = arith.constant 0 : index
    %c0_11 = arith.constant 0 : index
    %7 = vector.load %arg5[%c0_8, %c0_9, %c0_10, %c0_11] : memref<1x1x8x16xbf16, #tpu.memory_space<vmem>>, vector<1x1x8x16xbf16>
    %8 = vector.shape_cast %7 : vector<1x1x8x16xbf16> to vector<8x16xbf16>
    %cst = arith.constant dense<0.000000e+00> : vector<16x8xf32>
    %9 = tpu.matmul %4, %6, %cst {dimension_numbers = #tpu.dot_dimension_numbers<[1], [1], [0], [0], [0, 0, 1, 0], [], []>} : vector<16x16xbf16>, vector<8x16xbf16>, vector<16x8xf32> -> vector<16x8xf32>
    %cst_12 = arith.constant 2.500000e-01 : f32
    %10 = vector.broadcast %cst_12 : f32 to vector<16x8xf32>
    %11 = arith.mulf %9, %10 : vector<16x8xf32>
    %12 = tpu.iota {dimensions = array<i32: 0>} : vector<16x8xi32>
    %13 = tpu.iota {dimensions = array<i32: 1>} : vector<16x8xi32>
    %c8_i32 = arith.constant 8 : i32
    %c0_i32_13 = arith.constant 0 : i32
    %14 = arith.cmpi eq, %c8_i32, %c0_i32_13 : i32
    %c1_i32 = arith.constant 1 : i32
    %15 = arith.select %14, %c1_i32, %c8_i32 : i32
    %16 = vector.broadcast %15 : i32 to vector<16x8xi32>
    %17 = arith.remsi %12, %16 : vector<16x8xi32>
    %c0_i32_14 = arith.constant 0 : i32
    %18 = vector.broadcast %c0_i32_14 : i32 to vector<16x8xi32>
    %19 = arith.cmpi ne, %17, %18 : vector<16x8xi32>
    %c0_i32_15 = arith.constant 0 : i32
    %20 = vector.broadcast %c0_i32_15 : i32 to vector<16x8xi32>
    %21 = arith.cmpi slt, %17, %20 : vector<16x8xi32>
    %c0_i32_16 = arith.constant 0 : i32
    %22 = arith.cmpi slt, %15, %c0_i32_16 : i32
    %23 = vector.broadcast %22 : i1 to vector<16x8xi1>
    %24 = vector.broadcast %23 : vector<16x8xi1> to vector<16x8xi1>
    %25 = arith.xori %21, %24 : vector<16x8xi1>
    %26 = arith.andi %25, %19 : vector<16x8xi1>
    %27 = vector.broadcast %15 : i32 to vector<16x8xi32>
    %28 = arith.addi %17, %27 : vector<16x8xi32>
    %29 = arith.select %26, %28, %17 : vector<16x8xi1>, vector<16x8xi32>
    %c0_i32_17 = arith.constant 0 : i32
    %30 = vector.broadcast %c0_i32_17 : i32 to vector<16x8xi32>
    %31 = arith.addi %30, %29 : vector<16x8xi32>
    %c8_i32_18 = arith.constant 8 : i32
    %32 = arith.muli %arg2, %c8_i32_18 : i32
    %33 = vector.broadcast %32 : i32 to vector<16x8xi32>
    %34 = arith.addi %33, %13 : vector<16x8xi32>
    %35 = arith.cmpi sle, %34, %31 : vector<16x8xi32>
    %cst_19 = arith.constant 0xFF800000 : f32
    %36 = vector.broadcast %cst_19 : f32 to vector<16x8xf32>
    %37 = arith.select %35, %11, %36 : vector<16x8xi1>, vector<16x8xf32>
    %c0_20 = arith.constant 0 : index
    %c0_21 = arith.constant 0 : index
    %38 = vector.load %arg7[%c0_20, %c0_21] : memref<16x1xf32, #tpu.memory_space<vmem>>, vector<16x1xf32>
    %cst_22 = arith.constant dense<0xFF800000> : vector<16xf32>
    %39 = vector.multi_reduction <maximumf>, %37, %cst_22 [1] : vector<16x8xf32> to vector<16xf32>
    %40 = vector.shape_cast %39 : vector<16xf32> to vector<16x1xf32>
    %41 = arith.maximumf %38, %40 : vector<16x1xf32>
    %42 = arith.subf %38, %41 : vector<16x1xf32>
    %43 = math.exp %42 : vector<16x1xf32>
    %44 = vector.broadcast %41 : vector<16x1xf32> to vector<16x8xf32>
    %45 = arith.subf %37, %44 : vector<16x8xf32>
    %46 = math.exp %45 : vector<16x8xf32>
    %c0_23 = arith.constant 0 : index
    %c0_24 = arith.constant 0 : index
    %47 = vector.load %arg8[%c0_23, %c0_24] : memref<16x1xf32, #tpu.memory_space<vmem>>, vector<16x1xf32>
    %48 = arith.mulf %43, %47 : vector<16x1xf32>
    %cst_25 = arith.constant dense<0.000000e+00> : vector<16xf32>
    %49 = vector.multi_reduction <add>, %46, %cst_25 [1] : vector<16x8xf32> to vector<16xf32>
    %50 = vector.shape_cast %49 : vector<16xf32> to vector<16x1xf32>
    %51 = arith.addf %48, %50 : vector<16x1xf32>
    %c0_26 = arith.constant 0 : index
    %c0_27 = arith.constant 0 : index
    %52 = vector.load %arg8[%c0_26, %c0_27] : memref<16x1xf32, #tpu.memory_space<vmem>>, vector<16x1xf32>
    tpu.vector_store %arg8[%c0_26, %c0_27], %51 {strides = array<i32>} : memref<16x1xf32, #tpu.memory_space<vmem>>, vector<16x1xf32>,
    %c0_28 = arith.constant 0 : index
    %c0_29 = arith.constant 0 : index
    %53 = vector.load %arg9[%c0_28, %c0_29] : memref<16x16xf32, #tpu.memory_space<vmem>>, vector<16x16xf32>
    %54 = vector.broadcast %43 : vector<16x1xf32> to vector<16x16xf32>
    %55 = arith.mulf %54, %53 : vector<16x16xf32>
    %56 = arith.truncf %46 : vector<16x8xf32> to vector<16x8xbf16>
    %cst_30 = arith.constant dense<0.000000e+00> : vector<16x16xf32>
    %57 = tpu.matmul %56, %8, %cst_30 {dimension_numbers = #tpu.dot_dimension_numbers<[1], [0], [0], [1], [0, 0, 1, 1], [], []>} : vector<16x8xbf16>, vector<8x16xbf16>, vector<16x16xf32> -> vector<16x16xf32>
    %58 = arith.addf %55, %57 : vector<16x16xf32>
    %c0_31 = arith.constant 0 : index
    %c0_32 = arith.constant 0 : index
    %59 = vector.load %arg9[%c0_31, %c0_32] : memref<16x16xf32, #tpu.memory_space<vmem>>, vector<16x16xf32>
    tpu.vector_store %arg9[%c0_31, %c0_32], %58 {strides = array<i32>} : memref<16x16xf32, #tpu.memory_space<vmem>>, vector<16x16xf32>,
    %c0_33 = arith.constant 0 : index
    %c0_34 = arith.constant 0 : index
    %60 = vector.load %arg7[%c0_33, %c0_34] : memref<16x1xf32, #tpu.memory_space<vmem>>, vector<16x1xf32>
    tpu.vector_store %arg7[%c0_33, %c0_34], %41 {strides = array<i32>} : memref<16x1xf32, #tpu.memory_space<vmem>>, vector<16x1xf32>,
    %c0_i32_35 = arith.constant 0 : i32
    %61 = arith.cmpi eq, %arg2, %c0_i32_35 : i32
    %62 = arith.extui %61 : i1 to i32
    %c0_i32_36 = arith.constant 0 : i32
    %63 = arith.cmpi ne, %62, %c0_i32_36 : i32
    scf.if %63 {
      %c0_37 = arith.constant 0 : index
      %c0_38 = arith.constant 0 : index
      %64 = vector.load %arg9[%c0_37, %c0_38] : memref<16x16xf32, #tpu.memory_space<vmem>>, vector<16x16xf32>
      %c0_39 = arith.constant 0 : index
      %c0_40 = arith.constant 0 : index
      %65 = vector.load %arg8[%c0_39, %c0_40] : memref<16x1xf32, #tpu.memory_space<vmem>>, vector<16x1xf32>
      %66 = tpu.reciprocal %65 {approx = true} : vector<16x1xf32> -> vector<16x1xf32>
      %67 = vector.broadcast %66 : vector<16x1xf32> to vector<16x16xf32>
      %68 = arith.mulf %64, %67 : vector<16x16xf32>
      %69 = arith.truncf %68 : vector<16x16xf32> to vector<16x16xbf16>
      %c0_41 = arith.constant 0 : index
      %c0_42 = arith.constant 0 : index
      %c0_43 = arith.constant 0 : index
      %c0_44 = arith.constant 0 : index
      %70 = vector.load %arg6[%c0_41, %c0_42, %c0_43, %c0_44] : memref<1x1x16x16xbf16, #tpu.memory_space<vmem>>, vector<1x1x16x16xbf16>
      %71 = vector.shape_cast %70 : vector<1x1x16x16xbf16> to vector<16x16xbf16>
      %72 = vector.shape_cast %69 : vector<16x16xbf16> to vector<1x1x16x16xbf16>
      tpu.vector_store %arg6[%c0_41, %c0_42, %c0_43, %c0_44], %72 {strides = array<i32>} : memref<1x1x16x16xbf16, #tpu.memory_space<vmem>>, vector<1x1x16x16xbf16>,
    } else {
    }
    return
  }
  func.func @transform_0(%arg0: i32, %arg1: i32, %arg2: i32) -> (i32, i32, i32, i32) {
    %c0_i32 = arith.constant 0 : i32
    %c0_i32_0 = arith.constant 0 : i32
    %c0_i32_1 = arith.constant 0 : i32
    return %arg0, %arg1, %c0_i32, %c0_i32_0 : i32, i32, i32, i32
  }
  func.func @transform_1(%arg0: i32, %arg1: i32, %arg2: i32) -> (i32, i32, i32, i32) {
    %c0_i32 = arith.constant 0 : i32
    %c0_i32_0 = arith.constant 0 : i32
    return %arg0, %arg1, %arg2, %c0_i32 : i32, i32, i32, i32
  }
  func.func @transform_2(%arg0: i32, %arg1: i32, %arg2: i32) -> (i32, i32, i32, i32) {
    %c0_i32 = arith.constant 0 : i32
    %c0_i32_0 = arith.constant 0 : i32
    return %arg0, %arg1, %arg2, %c0_i32 : i32, i32, i32, i32
  }
  func.func @transform_3(%arg0: i32, %arg1: i32, %arg2: i32) -> (i32, i32, i32, i32) {
    %c0_i32 = arith.constant 0 : i32
    %c0_i32_0 = arith.constant 0 : i32
    %c0_i32_1 = arith.constant 0 : i32
    return %arg0, %arg1, %c0_i32, %c0_i32_0 : i32, i32, i32, i32
  }
}

module attributes {stable_mosaic.version = 11 : i64} {
  func.func @_ffn_kernel(%arg0: i32, %arg1: i32, %arg2: memref<16x64xbf16, #tpu.memory_space<vmem>>, %arg3: memref<64x256xbf16, #tpu.memory_space<vmem>>, %arg4: memref<64x256xbf16, #tpu.memory_space<vmem>>, %arg5: memref<256x64xbf16, #tpu.memory_space<vmem>>, %arg6: memref<16x64xbf16, #tpu.memory_space<vmem>>, %arg7: memref<16x64xf32, #tpu.memory_space<vmem>>) attributes {dimension_semantics = [#tpu.dimension_semantics<parallel>, #tpu.dimension_semantics<arbitrary>], iteration_bounds = array<i64: 1, 1>, scalar_prefetch = 0 : i64, scratch_operands = 1 : i64, tpu.core_type = #tpu.core_type<tc>, window_params = [{transform_indices = @transform_0, window_bounds = array<i64: 16, 64>}, {transform_indices = @transform_1, window_bounds = array<i64: 64, 256>}, {transform_indices = @transform_2, window_bounds = array<i64: 64, 256>}, {transform_indices = @transform_3, window_bounds = array<i64: 256, 64>}, {transform_indices = @transform_4, window_bounds = array<i64: 16, 64>}]} {
    %c0_i32 = arith.constant 0 : i32
    %0 = arith.cmpi eq, %arg1, %c0_i32 : i32
    %1 = arith.extui %0 : i1 to i32
    %c0_i32_0 = arith.constant 0 : i32
    %2 = arith.cmpi ne, %1, %c0_i32_0 : i32
    scf.if %2 {
      %cst_17 = arith.constant 0.000000e+00 : f32
      %24 = vector.broadcast %cst_17 : f32 to vector<16x64xf32>
      %c0_18 = arith.constant 0 : index
      %c0_19 = arith.constant 0 : index
      %25 = vector.load %arg7[%c0_18, %c0_19] : memref<16x64xf32, #tpu.memory_space<vmem>>, vector<16x64xf32>
      tpu.vector_store %arg7[%c0_18, %c0_19], %24 {strides = array<i32>} : memref<16x64xf32, #tpu.memory_space<vmem>>, vector<16x64xf32>,
    } else {
    }
    %c0 = arith.constant 0 : index
    %c0_1 = arith.constant 0 : index
    %3 = vector.load %arg2[%c0, %c0_1] : memref<16x64xbf16, #tpu.memory_space<vmem>>, vector<16x64xbf16>
    %c0_2 = arith.constant 0 : index
    %c0_3 = arith.constant 0 : index
    %4 = vector.load %arg3[%c0_2, %c0_3] : memref<64x256xbf16, #tpu.memory_space<vmem>>, vector<64x256xbf16>
    %cst = arith.constant dense<0.000000e+00> : vector<16x256xf32>
    %5 = tpu.matmul %3, %4, %cst {dimension_numbers = #tpu.dot_dimension_numbers<[1], [0], [0], [1], [0, 0, 1, 1], [], []>} : vector<16x64xbf16>, vector<64x256xbf16>, vector<16x256xf32> -> vector<16x256xf32>
    %c0_4 = arith.constant 0 : index
    %c0_5 = arith.constant 0 : index
    %6 = vector.load %arg4[%c0_4, %c0_5] : memref<64x256xbf16, #tpu.memory_space<vmem>>, vector<64x256xbf16>
    %cst_6 = arith.constant dense<0.000000e+00> : vector<16x256xf32>
    %7 = tpu.matmul %3, %6, %cst_6 {dimension_numbers = #tpu.dot_dimension_numbers<[1], [0], [0], [1], [0, 0, 1, 1], [], []>} : vector<16x64xbf16>, vector<64x256xbf16>, vector<16x256xf32> -> vector<16x256xf32>
    %8 = arith.negf %5 : vector<16x256xf32>
    %9 = math.exp %8 : vector<16x256xf32>
    %cst_7 = arith.constant 1.000000e+00 : f32
    %10 = vector.broadcast %cst_7 : f32 to vector<16x256xf32>
    %11 = arith.addf %10, %9 : vector<16x256xf32>
    %12 = arith.divf %10, %11 : vector<16x256xf32>
    %13 = arith.mulf %5, %12 : vector<16x256xf32>
    %14 = arith.mulf %13, %7 : vector<16x256xf32>
    %c0_8 = arith.constant 0 : index
    %c0_9 = arith.constant 0 : index
    %15 = vector.load %arg7[%c0_8, %c0_9] : memref<16x64xf32, #tpu.memory_space<vmem>>, vector<16x64xf32>
    %16 = arith.truncf %14 : vector<16x256xf32> to vector<16x256xbf16>
    %c0_10 = arith.constant 0 : index
    %c0_11 = arith.constant 0 : index
    %17 = vector.load %arg5[%c0_10, %c0_11] : memref<256x64xbf16, #tpu.memory_space<vmem>>, vector<256x64xbf16>
    %cst_12 = arith.constant dense<0.000000e+00> : vector<16x64xf32>
    %18 = tpu.matmul %16, %17, %cst_12 {dimension_numbers = #tpu.dot_dimension_numbers<[1], [0], [0], [1], [0, 0, 1, 1], [], []>} : vector<16x256xbf16>, vector<256x64xbf16>, vector<16x64xf32> -> vector<16x64xf32>
    %19 = arith.addf %15, %18 : vector<16x64xf32>
    %c0_13 = arith.constant 0 : index
    %c0_14 = arith.constant 0 : index
    %20 = vector.load %arg7[%c0_13, %c0_14] : memref<16x64xf32, #tpu.memory_space<vmem>>, vector<16x64xf32>
    tpu.vector_store %arg7[%c0_13, %c0_14], %19 {strides = array<i32>} : memref<16x64xf32, #tpu.memory_space<vmem>>, vector<16x64xf32>,
    %c0_i32_15 = arith.constant 0 : i32
    %21 = arith.cmpi eq, %arg1, %c0_i32_15 : i32
    %22 = arith.extui %21 : i1 to i32
    %c0_i32_16 = arith.constant 0 : i32
    %23 = arith.cmpi ne, %22, %c0_i32_16 : i32
    scf.if %23 {
      %c0_17 = arith.constant 0 : index
      %c0_18 = arith.constant 0 : index
      %24 = vector.load %arg7[%c0_17, %c0_18] : memref<16x64xf32, #tpu.memory_space<vmem>>, vector<16x64xf32>
      %25 = arith.truncf %24 : vector<16x64xf32> to vector<16x64xbf16>
      %c0_19 = arith.constant 0 : index
      %c0_20 = arith.constant 0 : index
      %26 = vector.load %arg6[%c0_19, %c0_20] : memref<16x64xbf16, #tpu.memory_space<vmem>>, vector<16x64xbf16>
      tpu.vector_store %arg6[%c0_19, %c0_20], %25 {strides = array<i32>} : memref<16x64xbf16, #tpu.memory_space<vmem>>, vector<16x64xbf16>,
    } else {
    }
    return
  }
  func.func @transform_0(%arg0: i32, %arg1: i32) -> (i32, i32) {
    %c0_i32 = arith.constant 0 : i32
    %c0_i32_0 = arith.constant 0 : i32
    return %arg0, %c0_i32 : i32, i32
  }
  func.func @transform_1(%arg0: i32, %arg1: i32) -> (i32, i32) {
    %c0_i32 = arith.constant 0 : i32
    %c0_i32_0 = arith.constant 0 : i32
    return %c0_i32, %arg1 : i32, i32
  }
  func.func @transform_2(%arg0: i32, %arg1: i32) -> (i32, i32) {
    %c0_i32 = arith.constant 0 : i32
    %c0_i32_0 = arith.constant 0 : i32
    return %c0_i32, %arg1 : i32, i32
  }
  func.func @transform_3(%arg0: i32, %arg1: i32) -> (i32, i32) {
    %c0_i32 = arith.constant 0 : i32
    %c0_i32_0 = arith.constant 0 : i32
    return %arg1, %c0_i32 : i32, i32
  }
  func.func @transform_4(%arg0: i32, %arg1: i32) -> (i32, i32) {
    %c0_i32 = arith.constant 0 : i32
    %c0_i32_0 = arith.constant 0 : i32
    return %arg0, %c0_i32 : i32, i32
  }
}

module attributes {stable_mosaic.version = 11 : i64} {
  func.func @_matmul_kernel(%arg0: i32, %arg1: i32, %arg2: i32, %arg3: memref<16x64xbf16, #tpu.memory_space<vmem>>, %arg4: memref<64x96xbf16, #tpu.memory_space<vmem>>, %arg5: memref<16x96xf32, #tpu.memory_space<vmem>>, %arg6: memref<16x96xf32, #tpu.memory_space<vmem>>) attributes {dimension_semantics = [#tpu.dimension_semantics<parallel>, #tpu.dimension_semantics<parallel>, #tpu.dimension_semantics<arbitrary>], iteration_bounds = array<i64: 1, 1, 1>, scalar_prefetch = 0 : i64, scratch_operands = 1 : i64, tpu.core_type = #tpu.core_type<tc>, window_params = [{transform_indices = @transform_0, window_bounds = array<i64: 16, 64>}, {transform_indices = @transform_1, window_bounds = array<i64: 64, 96>}, {transform_indices = @transform_2, window_bounds = array<i64: 16, 96>}]} {
    %c0_i32 = arith.constant 0 : i32
    %0 = arith.cmpi eq, %arg2, %c0_i32 : i32
    %1 = arith.extui %0 : i1 to i32
    %c0_i32_0 = arith.constant 0 : i32
    %2 = arith.cmpi ne, %1, %c0_i32_0 : i32
    scf.if %2 {
      %cst_10 = arith.constant 0.000000e+00 : f32
      %12 = vector.broadcast %cst_10 : f32 to vector<16x96xf32>
      %c0_11 = arith.constant 0 : index
      %c0_12 = arith.constant 0 : index
      %13 = vector.load %arg6[%c0_11, %c0_12] : memref<16x96xf32, #tpu.memory_space<vmem>>, vector<16x96xf32>
      tpu.vector_store %arg6[%c0_11, %c0_12], %12 {strides = array<i32>} : memref<16x96xf32, #tpu.memory_space<vmem>>, vector<16x96xf32>,
    } else {
    }
    %c0 = arith.constant 0 : index
    %c0_1 = arith.constant 0 : index
    %3 = vector.load %arg6[%c0, %c0_1] : memref<16x96xf32, #tpu.memory_space<vmem>>, vector<16x96xf32>
    %c0_2 = arith.constant 0 : index
    %c0_3 = arith.constant 0 : index
    %4 = vector.load %arg3[%c0_2, %c0_3] : memref<16x64xbf16, #tpu.memory_space<vmem>>, vector<16x64xbf16>
    %c0_4 = arith.constant 0 : index
    %c0_5 = arith.constant 0 : index
    %5 = vector.load %arg4[%c0_4, %c0_5] : memref<64x96xbf16, #tpu.memory_space<vmem>>, vector<64x96xbf16>
    %cst = arith.constant dense<0.000000e+00> : vector<16x96xf32>
    %6 = tpu.matmul %4, %5, %cst {dimension_numbers = #tpu.dot_dimension_numbers<[1], [0], [0], [1], [0, 0, 1, 1], [], []>} : vector<16x64xbf16>, vector<64x96xbf16>, vector<16x96xf32> -> vector<16x96xf32>
    %7 = arith.addf %3, %6 : vector<16x96xf32>
    %c0_6 = arith.constant 0 : index
    %c0_7 = arith.constant 0 : index
    %8 = vector.load %arg6[%c0_6, %c0_7] : memref<16x96xf32, #tpu.memory_space<vmem>>, vector<16x96xf32>
    tpu.vector_store %arg6[%c0_6, %c0_7], %7 {strides = array<i32>} : memref<16x96xf32, #tpu.memory_space<vmem>>, vector<16x96xf32>,
    %c0_i32_8 = arith.constant 0 : i32
    %9 = arith.cmpi eq, %arg2, %c0_i32_8 : i32
    %10 = arith.extui %9 : i1 to i32
    %c0_i32_9 = arith.constant 0 : i32
    %11 = arith.cmpi ne, %10, %c0_i32_9 : i32
    scf.if %11 {
      %c0_10 = arith.constant 0 : index
      %c0_11 = arith.constant 0 : index
      %12 = vector.load %arg6[%c0_10, %c0_11] : memref<16x96xf32, #tpu.memory_space<vmem>>, vector<16x96xf32>
      %c0_12 = arith.constant 0 : index
      %c0_13 = arith.constant 0 : index
      %13 = vector.load %arg5[%c0_12, %c0_13] : memref<16x96xf32, #tpu.memory_space<vmem>>, vector<16x96xf32>
      tpu.vector_store %arg5[%c0_12, %c0_13], %12 {strides = array<i32>} : memref<16x96xf32, #tpu.memory_space<vmem>>, vector<16x96xf32>,
    } else {
    }
    return
  }
  func.func @transform_0(%arg0: i32, %arg1: i32, %arg2: i32) -> (i32, i32) {
    %c0_i32 = arith.constant 0 : i32
    return %arg0, %arg2 : i32, i32
  }
  func.func @transform_1(%arg0: i32, %arg1: i32, %arg2: i32) -> (i32, i32) {
    %c0_i32 = arith.constant 0 : i32
    return %arg2, %arg1 : i32, i32
  }
  func.func @transform_2(%arg0: i32, %arg1: i32, %arg2: i32) -> (i32, i32) {
    %c0_i32 = arith.constant 0 : i32
    return %arg0, %arg1 : i32, i32
  }
}

</mosaic_0001>

<bundles_post_ra>
// kernel: run.14
= control target key start
LH: loop header
LB: loop body
LE: loop exit
PB: predicated region body
PF: predicated region fallthrough
CT: control target
= control target key end

     0   :  { %vm17_vm0 = vcmask 523264   ;;  %v35_v9 = vlaneseq  ;;  %vm49_vm1 = vcmask 519168   ;;  %s95_s0 = inlined_call_operand.vmem [shape: bf16[16,64], index: 0, kind: input, shape index: {}]   ;;  %s96_s1 = inlined_call_operand.vmem [shape: bf16[1,64], index: 1, kind: input, shape index: {}]   ;;  %s97_s2 = inlined_call_operand.vmem [shape: bf16[16,64], index: 2, kind: output, shape index: {}]  }
   0x1   :  { %v61_v0 = vld [vmem:[%s95_s0] sm:$0xff]  }
   0x2   :  { %v62_v1 = vunpack.c.l.bf16 %v61_v0  ;;  %v63_v2 = vunpack.c.h.bf16 %v61_v0  ;;  %v36_v13 = vshrl.u32 %v35_v9, 7  ;;  %v33_v14 = vld [vmem:[%s96_s1] sm:$0x1] }
   0x3   :  { %v34_v16 = vunpack.c.l.bf16 %v33_v14 }
   0x4   :  { %v15_v3 = vmul.f32 %v62_v1, %v62_v1  ;;  %v16_v4 = vmul.f32 %v63_v2, %v63_v2  ;;  %v37_v17 = vsub.s32 0, %v36_v13 }
   0x6   :  { %v18_v5 = vsel %vm17_vm0, %v15_v3, 0.0  ;;  %v21_v6 = vsel %vm17_vm0, %v16_v4, 0.0  ;;  %v38_v18 = vrot.slane %v34_v16, %v37_v17 }
   0x7   :  { %19 = vadd.xlane.f32.xlu0 %v18_v5 }
   0xb   :  { %22 = vadd.xlane.f32.xlu0 %v21_v6 }
  0x94   :  { %v20_v7 = vpop.xlane.xlu0 %19 }
  0x95   :  { %v25_v8 = vmul.f32 0.015625, %v20_v7 }
  0x97   :  { %v27_v10 = vadd.f32 1e-05, %v25_v8 }
  0x98   :  { %v23_v11 = vpop.xlane.xlu0 %22 }
  0x99   :  { %64 = vrsqrt.f32 %v27_v10  ;;  %v26_v12 = vmul.f32 0.015625, %v23_v11 }
  0x9b   :  { %v28_v15 = vadd.f32 1e-05, %v26_v12 }
  0x9d   :  { %66 = vrsqrt.f32 %v28_v15 }
  0xa3   :  { %v65_v19 = vpop.eup %64 }
  0xa4   :  { %v31_v20 = vmul.f32 %v65_v19, %v62_v1 }
  0xa6   :  { %v39_v21 = vmul.f32 %v38_v18, %v31_v20 }
  0xa7   :  { %v67_v22 = vpop.eup %66 }
  0xa8   :  { %v58_v23 = vpack.c.bf16 %v39_v21, %v39_v21  ;;  %v32_v24 = vmul.f32 %v67_v22, %v63_v2 }
  0xaa   :  { %50 = vst.msk [vmem:[%s97_s2] sm:$0xf] %vm49_vm1, %v58_v23  ;;  %v40_v25 = vmul.f32 %v38_v18, %v32_v24 }
  0xac   :  { %v59_v26 = vpack.c.bf16 %v40_v25, %v40_v25 }
  0xae   :  { %51 = vst.msk [vmem:[%s97_s2 + $0x4] sm:$0xf] %vm49_vm1, %v59_v26 }

// kernel: run.15
= control target key start
LH: loop header
LB: loop body
LE: loop exit
PB: predicated region body
PF: predicated region fallthrough
CT: control target
= control target key end

     0   :  { %v166_v0 = vmov 0.0   ;;  %vm167_vm0 = vmmov 0   ;;  %vm59_vm1 = vcmask 523264   ;;  %s201_s1 = inlined_call_operand.vmem [shape: bf16[64,128], index: 1, kind: input, shape index: {}]   ;;  %s202_s0 = inlined_call_operand.vmem [shape: bf16[16,64], index: 0, kind: input, shape index: {}]   ;;  %s203_s2 = inlined_call_operand.vmem [shape: bf16[16,128], index: 2, kind: output, shape index: {}]  }
   0x1   :  { %147 = vmatprep.subr.bf16.mxu0 %v166_v0  ;;  %v161_v1 = vld [vmem:[%s201_s1] sm:$0xff]   ;;  %155 = vmatprep.mubr.msk.bf16.mxu0 %vm167_vm0, %v166_v0  ;;  %v162_v2 = vld [vmem:[%s201_s1 + $0x8] sm:$0xff]   ;;  %v163_v3 = vld [vmem:[%s201_s1 + $0x10] sm:$0xff]  }
   0x2   :  { %148 = vmatpush3.bf16.msra.mxu0 %v161_v1  ;;  %v164_v4 = vld [vmem:[%s201_s1 + $0x18] sm:$0xff]   ;;  %v165_v5 = vld [vmem:[%s202_s0] sm:$0xff]  }
   0x3   :  { %149 = vmatprep.subr.bf16.mxu0 %v166_v0 }
   0x6   :  { %150 = vmatpush3.bf16.msra.mxu0 %v162_v2 }
   0x7   :  { %151 = vmatprep.subr.bf16.mxu0 %v166_v0 }
   0xa   :  { %152 = vmatpush3.bf16.msra.mxu0 %v163_v3 }
   0xb   :  { %153 = vmatprep.subr.bf16.mxu0 %v166_v0 }
   0xe   :  { %154 = vmatpush3.bf16.msra.mxu0 %v164_v4 }
  0x11   :  { %156 = vmatmul.mubr.msk.bf16.vlgmr.msra.gmra.mrb[0].mxu0 %vm59_vm1, %v165_v5 }
  0xe4   :  { %v97_v6 = vpop.f32.mrb[0].mxu0 }
  0xe5   :  { %v157_v7 = vpop.f32.mrb[1].mxu0 }
  0xe6   :  { %v100_v8 = vpop.f32.mrb[2].mxu0 }
  0xe7   :  { %v140_v9 = vpack.c.bf16 %v100_v8, %v97_v6  ;;  %v158_v10 = vpop.f32.mrb[3].mxu0 }
  0xe9   :  { %141 = vst [vmem:[%s203_s2] sm:$0xff] %v140_v9  }

// kernel: run.17
= control target key start
LH: loop header
LB: loop body
LE: loop exit
PB: predicated region body
PF: predicated region fallthrough
CT: control target
= control target key end

     0   :  { %vm16_vm0 = vcmask 523264   ;;  %v163_v0 = vmov 0.0   ;;  %vm164_vm1 = vmmov 0   ;;  %vm122_vm2 = vcmask 519168   ;;  %s206_s1 = inlined_call_operand.vmem [shape: bf16[64,64], index: 1, kind: input, shape index: {}]   ;;  %s207_s0 = inlined_call_operand.vmem [shape: bf16[16,64], index: 0, kind: input, shape index: {}]   ;;  %s208_s2 = inlined_call_operand.vmem [shape: bf16[16,64], index: 2, kind: output, shape index: {}]  }
   0x1   :  { %144 = vmatprep.subr.bf16.mxu0 %v163_v0  ;;  %v158_v1 = vld [vmem:[%s206_s1] sm:$0xff]   ;;  %152 = vmatprep.mubr.msk.bf16.mxu0 %vm164_vm1, %v163_v0  ;;  %17 = vst.msk [vmem:[#allocation2] sm:$0xff] %vm16_vm0, %v163_v0  ;;  %18 = vst.msk [vmem:[#allocation2 + $0x8] sm:$0xff] %vm16_vm0, %v163_v0  ;;  %v159_v2 = vld [vmem:[%s206_s1 + $0x8] sm:$0xff]  }
   0x2   :  { %145 = vmatpush3.bf16.msra.mxu0 %v158_v1  ;;  %v160_v3 = vld [vmem:[%s206_s1 + $0x10] sm:$0xff]   ;;  %v161_v4 = vld [vmem:[%s206_s1 + $0x18] sm:$0xff]   ;;  %v162_v5 = vld [vmem:[%s207_s0] sm:$0xff]  }
   0x3   :  { %146 = vmatprep.subr.bf16.mxu0 %v163_v0 }
   0x6   :  { %147 = vmatpush3.bf16.msra.mxu0 %v159_v2 }
   0x7   :  { %148 = vmatprep.subr.bf16.mxu0 %v163_v0 }
   0x8   :  { %v19_v6 = vld [vmem:[#allocation2] sm:$0xff]  ;;  %v20_v8 = vld [vmem:[#allocation2 + $0x8] sm:$0xff] }
   0xa   :  { %149 = vmatpush3.bf16.msra.mxu0 %v160_v3 }
   0xb   :  { %150 = vmatprep.subr.bf16.mxu0 %v163_v0 }
   0xe   :  { %151 = vmatpush3.bf16.msra.mxu0 %v161_v4 }
  0x11   :  { %153 = vmatmul.mubr.msk.bf16.vlgmr.msra.gmra.mrb[0].mxu0 %vm16_vm0, %v162_v5 }
  0xe4   :  { %v98_v7 = vpop.f32.mrb[0].mxu0 }
  0xe5   :  { %v105_v9 = vadd.f32 %v98_v7, %v19_v6  ;;  %v154_v10 = vpop.f32.mrb[1].mxu0 }
  0xe6   :  { %v101_v11 = vpop.f32.mrb[2].mxu0 }
  0xe7   :  { %107 = vst.msk [vmem:[#allocation2] sm:$0xff] %vm16_vm0, %v105_v9  ;;  %v106_v12 = vadd.f32 %v101_v11, %v20_v8  ;;  %v155_v13 = vpop.f32.mrb[3].mxu0 }
  0xe9   :  { %108 = vst.msk [vmem:[#allocation2 + $0x8] sm:$0xff] %vm16_vm0, %v106_v12 }
  0xee   :  { %v112_v14 = vld [vmem:[#allocation2] sm:$0xff] }
  0xef   :  { %v137_v15 = vpack.c.bf16 %v112_v14, %v112_v14 }
  0xf0   :  { %v113_v16 = vld [vmem:[#allocation2 + $0x8] sm:$0xff] }
  0xf1   :  { %123 = vst.msk [vmem:[%s208_s2] sm:$0xf] %vm122_vm2, %v137_v15  ;;  %v138_v17 = vpack.c.bf16 %v113_v16, %v113_v16 }
  0xf3   :  { %124 = vst.msk [vmem:[%s208_s2 + $0x4] sm:$0xf] %vm122_vm2, %v138_v17 }

// kernel: run.16
= control target key start
LH: loop header
LB: loop body
LE: loop exit
PB: predicated region body
PF: predicated region fallthrough
CT: control target
= control target key end

     0   :  { %s858_s12 = smov 0   ;;  %s860_s13 = smov 0   ;;  %s948_s0 = inlined_call_operand.vmem [shape: bf16[2,2,16,16], index: 0, kind: input, shape index: {}]   ;;  %s949_s1 = inlined_call_operand.vmem [shape: bf16[2,2,8,16], index: 1, kind: input, shape index: {}]   ;;  %s950_s2 = inlined_call_operand.vmem [shape: bf16[2,2,8,16], index: 2, kind: input, shape index: {}]   ;;  %s951_s3 = inlined_call_operand.vmem [shape: bf16[2,2,16,16], index: 3, kind: output, shape index: {}]  }
   0x1   :  { %s862_s14 = smov 0   ;;  %s864_s15 = smov 0  }
   0x2   :  { %s866_s16 = smov 0  }
   0x3 LB: > { %s28_s17 = sadd.s32 1, %s824_s14  ;;  %s32_s18 = sadd.s32 1, %s828_s15  ;;  %s832_s16 = sphi %s866_s16, %s13_s16   ;;  %s828_s15 = sphi %s864_s15, %s955_s15   ;;  %s824_s14 = sphi %s862_s14, %s954_s14   ;;  %s820_s13 = sphi %s860_s13, %s953_s13   ;;  %s816_s12 = sphi %s858_s12, %s952_s12  }
   0x4   : > { %p30_p0 = scmp.ge.s32.totalorder %s28_s17, 2  ;;  %p699_p1 = scmp.ge.s32.totalorder %s832_s16, 1 }
   0x5   : > { %p204_p2 = scmp.lt.s32.totalorder %s832_s16, 5 }
   0x6   : > { %s957_s17 = smov (%p30_p0, %s28_s17), 0  ;;  %s959_s18 = smov (!%p30_p0, %s32_s18), %s828_s15 }
   0x7   : > { %p205_p3 = pnand %p699_p1, %p204_p2  ;;  %p34_p4 = scmp.ge.s32.totalorder %s959_s18, 2 }
   0x8   : > { %p258_p5 = scmp.lt.s32.totalorder (!%p205_p3), %s820_s13, 1  ;;  %p260_p6 = scmp.lt.s32.totalorder (!%p205_p3), %s816_s12, 1  ;;  %vm308_vm0 = vcmask (!%p205_p3), 130048   ;;  %v834_v0 = vmov (!%p205_p3), 0.0   ;;  %vm835_vm1 = vmmov (!%p205_p3), 0   ;;  %vm303_vm2 = vcmask (!%p205_p3), 7168  }
   0x9   : > { %s961_s18 = smov (%p34_p4, %s959_s18), 0  ;;  %208 = sbr.rel (%p205_p3) target bundleno = 834 (0x342), region = 32 }
   0xa   : > { %723 = vmatprep.subr.bf16.mxu0 (!%p205_p3), %v834_v0  ;;  %309 = vst.msk [vmem:[#allocation4] sm:$0xff] (!%p205_p3), %vm308_vm0, %v834_v0  ;;  %310 = vst.msk [vmem:[#allocation4 + $0x8] sm:$0xff] (!%p205_p3), %vm308_vm0, %v834_v0  ;;  %725 = vmatprep.mubr.msk.bf16.mxu0 (!%p205_p3), %vm835_vm1, %v834_v0  ;;  %v836_v4 = vmov (!%p205_p3), -inf   ;;  %v370_v5 = vlaneseq (!%p205_p3)  ;;  %vm408_vm4 = vcmask (!%p205_p3), 64512   ;;  %v837_v21 = vmov (!%p205_p3), 0  }
   0xb   : > { %729 = vmatprep.subr.bf16.mxu1 (!%p205_p3), %v834_v0  ;;  %731 = vmatprep.mubr.msk.bf16.mxu1 (!%p205_p3), %vm835_vm1, %v834_v0  ;;  %304 = vst.msk [vmem:[#allocation2] sm:$0xff] (!%p205_p3), %vm303_vm2, %v836_v4  ;;  %305 = vst.msk [vmem:[#allocation2 + $0x8] sm:$0xff] (!%p205_p3), %vm303_vm2, %v836_v4  ;;  %vm472_vm6 = vcmask (!%p205_p3), 1043456   ;;  %vm552_vm7 = vcmask (!%p205_p3), 125952  }
   0xc   : > { %306 = vst.msk [vmem:[#allocation3] sm:$0xff] (!%p205_p3), %vm303_vm2, %v834_v0  ;;  %307 = vst.msk [vmem:[#allocation3 + $0x8] sm:$0xff] (!%p205_p3), %vm303_vm2, %v834_v0  ;;  %v371_v6 = vshrl.u32 (!%p205_p3), %v370_v5, 7  ;;  %v374_v8 = vand.u32 (!%p205_p3), 127, %v370_v5  ;;  %779 = vset.pattern.permute.xlu1 (!%p205_p3), %v837_v21  ;;  %780 = vset.pattern.permute.xlu0 (!%p205_p3), %v837_v21 }
   0xe   : > { %v372_v7 = vadd.s32 (!%p205_p3), 8, %v371_v6  ;;  %v379_v9 = vand.u32 (!%p205_p3), 7, %v371_v6 }
  0x10   : > { %s963_s13 = smov (!%p258_p5, %s820_s13), 1  ;;  %s965_s12 = smov (!%p260_p6, %s816_s12), 1  ;;  %v386_v10 = vand.u32 7, %v372_v7  ;;  %vm402_vm3 = vcmp.le.s32.totalorder %v374_v8, %v379_v9 }
  0x11   : > { %s701_s19 = sshll.u32 %s963_s13, 2  ;;  %s703_s20 = sshll.u32 %s963_s13, 1  ;;  %v454_v59 = vld [vmem:[#allocation4] sm:$0xff]  ;;  %v455_v61 = vld [vmem:[#allocation4 + $0x8] sm:$0xff] }
  0x12   : > { %s700_s21 = sshll.u32 %s965_s12, 1  ;;  %s890_s22 = sadd.s32 %s703_s20, %s965_s12  ;;  %vm403_vm5 = vcmp.le.s32.totalorder %v374_v8, %v386_v10  ;;  %v406_v22 = vld [vmem:[#allocation2] sm:$0xff]  ;;  %v407_v25 = vld [vmem:[#allocation2 + $0x8] sm:$0xff] }
  0x13   : > { %s892_s23 = sadd.s32 %s701_s19, %s700_s21  ;;  %s704_s24 = sshll.u32 %s890_s22, 2  ;;  %v439_v47 = vld [vmem:[#allocation3] sm:$0xff]  ;;  %v440_v50 = vld [vmem:[#allocation3 + $0x8] sm:$0xff] }
  0x14   : > { %s702_s25 = sshll.u32 %s892_s23, 2  ;;  %s277_s28 = scalar_lea.vmem %s949_s1, %s704_s24 }
  0x15   : > { %s266_s4 = scalar_lea.vmem %s948_s0, %s702_s25  ;;  %v313_v1 = vld [vmem:[%s277_s28] sm:$0xf]  ;;  %s288_s7 = scalar_lea.vmem %s950_s2, %s704_s24 }
  0x16   : > { %v325_v2 = vsel %vm308_vm0, %v313_v1, 0  ;;  %v781_v3 = vld [vmem:[%s266_s4] sm:$0xff]   ;;  %s297_s10 = scalar_lea.vmem %s951_s3, %s702_s25 }
  0x17   : > { %724 = vmatpush3.bf16.xpose.msra.mxu0 %v325_v2  ;;  %v314_v30 = vld [vmem:[%s288_s7] sm:$0xf] }
  0x18   : > { %v474_v31 = vsel %vm472_vm6, %v314_v30, 0 }
  0x19   : > { %730 = vmatpush3.bf16.msra.mxu1 %v474_v31 }
  0x1e   : > { %726 = vmatmul.mubr.msk.bf16.vlgmr.msra.gmra.mrb[0].mxu0 %vm308_vm0, %v781_v3 }
  0xf1   : > { %v361_v11 = vpop.f32.mrb[0].mxu0 }
  0xf2   : > { %v368_v12 = vmul.f32 0.25, %v361_v11  ;;  %v727_v13 = vpop.f32.mrb[1].mxu0 }
  0xf3   : > { %v364_v14 = vpop.f32.mrb[2].mxu0 }
  0xf4   : > { %v369_v15 = vmul.f32 0.25, %v364_v14  ;;  %v728_v16 = vpop.f32.mrb[3].mxu0  ;;  %v404_v17 = vsel %vm402_vm3, %v368_v12, -inf }
  0xf5   : > { %v409_v18 = vsel %vm408_vm4, %v404_v17, -inf }
  0xf6   : > { %410 = vmax.xlane.f32.xlu0 %v409_v18  ;;  %v405_v19 = vsel %vm403_vm5, %v369_v15, -inf }
  0xf7   : > { %v412_v20 = vsel %vm408_vm4, %v405_v19, -inf }
  0xfa   : > { %413 = vmax.xlane.f32.xlu0 %v412_v20 }
 0x183   : > { %v411_v23 = vpop.xlane.xlu0 %410 }
 0x184   : > { %v415_v24 = vmax.f32 %v406_v22, %v411_v23 }
 0x186   : > { %v417_v26 = vsub.f32 %v406_v22, %v415_v24  ;;  %521 = vst.msk [vmem:[#allocation2] sm:$0xff] %vm303_vm2, %v415_v24  ;;  %425 = vperm.xlu1 %779, %v415_v24  }
 0x187   : > { %v414_v27 = vpop.xlane.xlu0 %413 }
 0x188   : > { %v416_v28 = vmax.f32 %v407_v25, %v414_v27  ;;  %v419_v44 = vmul.f32 1.442695, %v417_v26 }
 0x18a   : > { %v418_v29 = vsub.f32 %v407_v25, %v416_v28  ;;  %522 = vst.msk [vmem:[#allocation2 + $0x8] sm:$0xff] %vm303_vm2, %v416_v28  ;;  %430 = vperm.xlu1 %779, %v416_v28  }
 0x18c   : > { %v421_v43 = vmul.f32 1.442695, %v418_v29 }
 0x205   : > { %v426_v32 = vpop.permute.xlu1 %425 }
 0x206   : > { %v433_v33 = vsub.f32 %v404_v17, %v426_v32 }
 0x208   : > { %v435_v34 = vmul.f32 1.442695, %v433_v33 }
 0x209   : > { %v431_v35 = vpop.permute.xlu1 %430 }
 0x20a   : > { %782 = vpow2.f32 %v435_v34  ;;  %v434_v36 = vsub.f32 %v405_v19, %v431_v35 }
 0x20c   : > { %v437_v37 = vmul.f32 1.442695, %v434_v36 }
 0x20e   : > { %784 = vpow2.f32 %v437_v37 }
 0x20f   : > { %786 = vpow2.f32 %v421_v43 }
 0x210   : > { %788 = vpow2.f32 %v419_v44 }
 0x214   : > { %v783_v38 = vpop.eup %782 }
 0x215   : > { %v443_v39 = vsel %vm408_vm4, %v783_v38, 0.0 }
 0x216   : > { %444 = vadd.xlane.f32.xlu0 %v443_v39 }
 0x218   : > { %v785_v40 = vpop.eup %784 }
 0x219   : > { %v446_v41 = vsel %vm408_vm4, %v785_v40, 0.0  ;;  %v468_v42 = vpack.c.bf16 %v785_v40, %v783_v38  ;;  %v787_v45 = vpop.eup %786 }
 0x21a   : > { %447 = vadd.xlane.f32.xlu1 %v446_v41  ;;  %v789_v46 = vpop.eup %788  ;;  %v442_v52 = vmul.f32 %v787_v45, %v440_v50 }
 0x21b   : > { %732 = vmatmul.mubr.msk.bf16.vlgmr.msra.gmra.mrb[0].mxu1 %vm408_vm4, %v468_v42  ;;  %v441_v48 = vmul.f32 %v789_v46, %v439_v47 }
 0x22b   : > { %463 = vperm.xlu1 %779, %v787_v45  }
 0x22c   : > { %458 = vperm.xlu0 %780, %v789_v46  }
 0x2a3   : > { %v445_v49 = vpop.xlane.xlu0 %444 }
 0x2a4   : > { %v449_v51 = vadd.f32 %v445_v49, %v441_v48 }
 0x2a6   : > { %452 = vst.msk [vmem:[#allocation3] sm:$0xff] %vm303_vm2, %v449_v51 }
 0x2a7   : > { %v448_v53 = vpop.xlane.xlu1 %447 }
 0x2a8   : > { %v450_v54 = vadd.f32 %v448_v53, %v442_v52 }
 0x2aa   : > { %453 = vst.msk [vmem:[#allocation3 + $0x8] sm:$0xff] %vm303_vm2, %v450_v54 }
 0x2ab   : > { %v459_v60 = vpop.permute.xlu0 %458  ;;  %v464_v62 = vpop.permute.xlu1 %463 }
 0x2ac   : > { %v466_v63 = vmul.f32 %v459_v60, %v454_v59  ;;  %v467_v1 = vmul.f32 %v464_v62, %v455_v61 }
 0x2ad   : > { %v528_v55 = vld [vmem:[#allocation3] sm:$0xff] }
 0x2ae   : > { %790 = vrcp.f32 %v528_v55 }
 0x2b1   : > { %v529_v56 = vld [vmem:[#allocation3 + $0x8] sm:$0xff] }
 0x2b2   : > { %792 = vrcp.f32 %v529_v56 }
 0x2b8   : > { %v791_v57 = vpop.eup %790 }
 0x2b9   : > { %534 = vperm.xlu0 %780, %v791_v57  }
 0x2bc   : > { %v793_v58 = vpop.eup %792 }
 0x2bd   : > { %539 = vperm.xlu0 %780, %v793_v58  }
 0x2ee   : > { %v510_v0 = vpop.f32.mrb[0].mxu1 }
 0x2ef   : > { %v517_v2 = vadd.f32 %v510_v0, %v466_v63  ;;  %v733_v3 = vpop.f32.mrb[1].mxu1 }
 0x2f0   : > { %v513_v4 = vpop.f32.mrb[2].mxu1 }
 0x2f1   : > { %519 = vst.msk [vmem:[#allocation4] sm:$0xff] %vm308_vm0, %v517_v2  ;;  %v518_v5 = vadd.f32 %v513_v4, %v467_v1  ;;  %v734_v6 = vpop.f32.mrb[3].mxu1 }
 0x2f3   : > { %520 = vst.msk [vmem:[#allocation4 + $0x8] sm:$0xff] %vm308_vm0, %v518_v5 }
 0x2f8   : > { %v526_v7 = vld [vmem:[#allocation4] sm:$0xff] }
 0x2fa   : > { %v527_v11 = vld [vmem:[#allocation4 + $0x8] sm:$0xff] }
 0x338   : > { %v535_v8 = vpop.permute.xlu0 %534 }
 0x339   : > { %v542_v9 = vmul.f32 %v535_v8, %v526_v7 }
 0x33b   : > { %v717_v10 = vpack.c.bf16 %v542_v9, %v542_v9 }
 0x33c   : > { %v540_v12 = vpop.permute.xlu0 %539 }
 0x33d   : > { %553 = vst.msk [vmem:[%s297_s10] sm:$0xf] %vm552_vm7, %v717_v10  ;;  %v543_v13 = vmul.f32 %v540_v12, %v527_v11 }
 0x33f   : > { %v718_v14 = vpack.c.bf16 %v543_v13, %v543_v13 }
 0x341   : > { %554 = vst.msk [vmem:[%s297_s10 + $0x4] sm:$0xf] %vm552_vm7, %v718_v14 }
 0x342 PF: > { %s13_s16 = sadd.s32 1, %s832_s16   ;;  %s952_s12 = smov %s824_s14 }
 0x343   : > { %p10_p7 = scmp.ge.s32.totalorder %s13_s16, 6   ;;  %s953_s13 = smov %s828_s15 }
 0x344   : > { %s954_s14 = smov %s957_s17  ;;  %s955_s15 = smov %s961_s18 }
 0x345   :  { %12 = sbr.rel (!%p10_p7) target bundleno = 3 (0x3), region = 76 }

// kernel: run.19
= control target key start
LH: loop header
LB: loop body
LE: loop exit
PB: predicated region body
PF: predicated region fallthrough
CT: control target
= control target key end

     0   :  { %v571_v1 = vmov 0   ;;  %vm22_vm0 = vcmask 523264   ;;  %vm440_vm1 = vcmask 519168   ;;  %s709_s1 = inlined_call_operand.vmem [shape: bf16[64,256], index: 1, kind: input, shape index: {}]   ;;  %s710_s0 = inlined_call_operand.vmem [shape: bf16[16,64], index: 0, kind: input, shape index: {}]   ;;  %s711_s2 = inlined_call_operand.vmem [shape: bf16[64,256], index: 2, kind: input, shape index: {}]   ;;  %s712_s3 = inlined_call_operand.vmem [shape: bf16[256,64], index: 3, kind: input, shape index: {}]   ;;  %s713_s4 = inlined_call_operand.vmem [shape: bf16[16,64], index: 4, kind: output, shape index: {}]  }
   0x1   :  { %v514_v0 = vld [vmem:[%s709_s1 + $0x4] ss:$8 sps:$4 sm:$0xff]   ;;  %116 = vmatprep.mubr.bf16.mxu1 %v571_v1  ;;  %v516_v2 = vld [vmem:[%s709_s1] ss:$8 sps:$4 sm:$0xff]   ;;  %v517_v3 = vld [vmem:[%s709_s1 + $0x14] ss:$8 sps:$4 sm:$0xff]  }
   0x2   :  { %84 = vmatprep.subr.bf16.mxu1 %v514_v0  ;;  %v519_v4 = vld [vmem:[%s709_s1 + $0x10] ss:$8 sps:$4 sm:$0xff]   ;;  %v520_v5 = vld [vmem:[%s709_s1 + $0x24] ss:$8 sps:$4 sm:$0xff]   ;;  %v522_v6 = vld [vmem:[%s709_s1 + $0x20] ss:$8 sps:$4 sm:$0xff]  }
   0x3   :  { %85 = vmatpush1.bf16.msra.mxu1 %v516_v2  ;;  %v523_v7 = vld [vmem:[%s709_s1 + $0x34] ss:$8 sps:$4 sm:$0xff]   ;;  %v525_v8 = vld [vmem:[%s709_s1 + $0x30] ss:$8 sps:$4 sm:$0xff]   ;;  %v529_v9 = vld [vmem:[%s711_s2 + $0x4] ss:$8 sps:$4 sm:$0xff]  }
   0x4   :  { %86 = vmatprep.subr.bf16.mxu1 %v517_v3  ;;  %v526_v10 = vld [vmem:[%s710_s0] sm:$0xff]   ;;  %v532_v12 = vld [vmem:[%s711_s2 + $0x14] ss:$8 sps:$4 sm:$0xff]   ;;  %v530_v13 = vld [vmem:[%s711_s2 + $0x10] ss:$8 sps:$4 sm:$0xff]  }
   0x5   :  { %v527_v11 = vld [vmem:[%s711_s2] ss:$8 sps:$4 sm:$0xff]   ;;  %v535_v14 = vld [vmem:[%s711_s2 + $0x24] ss:$8 sps:$4 sm:$0xff]   ;;  %v538_v16 = vld [vmem:[%s711_s2 + $0x34] ss:$8 sps:$4 sm:$0xff]  }
   0x6   :  { %v533_v15 = vld [vmem:[%s711_s2 + $0x20] ss:$8 sps:$4 sm:$0xff]   ;;  %v536_v17 = vld [vmem:[%s711_s2 + $0x30] ss:$8 sps:$4 sm:$0xff]  }
   0x7   :  { %87 = vmatpush1.bf16.msra.mxu1 %v519_v4  ;;  %v539_v18 = vld [vmem:[%s712_s3 + $0x40] sm:$0xff]   ;;  %v541_v20 = vld [vmem:[%s712_s3 + $0x48] sm:$0xff]   ;;  %v543_v22 = vld [vmem:[%s712_s3 + $0x50] sm:$0xff]   ;;  %v572_v4 = vmov 0.0  }
   0x8   :  { %88 = vmatprep.subr.bf16.mxu1 %v520_v5  ;;  %v540_v19 = vld [vmem:[%s712_s3] sm:$0xff]   ;;  %490 = vmatprep.subr.bf16.mxu0 %v539_v18  ;;  %v542_v21 = vld [vmem:[%s712_s3 + $0x8] sm:$0xff]   ;;  %v544_v23 = vld [vmem:[%s712_s3 + $0x10] sm:$0xff]   ;;  %23 = vst.msk [vmem:[#allocation2] sm:$0xff] %vm22_vm0, %v572_v4 }
   0x9   :  { %491 = vmatpush3.bf16.msra.mxu0 %v540_v19  ;;  %v545_v24 = vld [vmem:[%s712_s3 + $0x58] sm:$0xff]   ;;  %v547_v26 = vld [vmem:[%s712_s3 + $0x60] sm:$0xff]   ;;  %v549_v28 = vld [vmem:[%s712_s3 + $0x68] sm:$0xff]   ;;  %24 = vst.msk [vmem:[#allocation2 + $0x8] sm:$0xff] %vm22_vm0, %v572_v4 }
   0xa   :  { %492 = vmatprep.subr.bf16.mxu0 %v541_v20  ;;  %v546_v25 = vld [vmem:[%s712_s3 + $0x18] sm:$0xff]   ;;  %v548_v27 = vld [vmem:[%s712_s3 + $0x20] sm:$0xff]   ;;  %v550_v29 = vld [vmem:[%s712_s3 + $0x28] sm:$0xff]  }
   0xb   :  { %89 = vmatpush1.bf16.msra.mxu1 %v522_v6  ;;  %v551_v30 = vld [vmem:[%s712_s3 + $0x70] sm:$0xff]   ;;  %v553_v32 = vld [vmem:[%s712_s3 + $0x78] sm:$0xff]  }
   0xc   :  { %90 = vmatprep.subr.bf16.mxu1 %v523_v7  ;;  %v552_v31 = vld [vmem:[%s712_s3 + $0x30] sm:$0xff]   ;;  %v554_v33 = vld [vmem:[%s712_s3 + $0x38] sm:$0xff]  }
   0xd   :  { %493 = vmatpush3.bf16.msra.mxu0 %v542_v21 }
   0xe   :  { %494 = vmatprep.subr.bf16.mxu0 %v543_v22 }
   0xf   :  { %91 = vmatpush1.bf16.msra.mxu1 %v525_v8  ;;  %v250_v6 = vld [vmem:[#allocation2] sm:$0xff] }
  0x10   :  { %175 = vmatprep.subr.bf16.mxu1 %v529_v9 }
  0x11   :  { %495 = vmatpush3.bf16.msra.mxu0 %v544_v23 }
  0x12   :  { %456 = vmatmul.mubr.msk.bf16.vlgmr.msra.gmra.mrb[0].mxu1 %vm22_vm0, %v526_v10  ;;  %496 = vmatprep.subr.bf16.mxu0 %v545_v24 }
  0x13   :  { %176 = vmatpush1.bf16.msra.mxu1 %v527_v11  ;;  %207 = vmatprep.mubr.bf16.mxu1 %v571_v1 }
  0x14   :  { %177 = vmatprep.subr.bf16.mxu1 %v532_v12 }
  0x15   :  { %497 = vmatpush3.bf16.msra.mxu0 %v546_v25 }
  0x16   :  { %498 = vmatprep.subr.bf16.mxu0 %v547_v26 }
  0x17   :  { %178 = vmatpush1.bf16.msra.mxu1 %v530_v13 }
  0x18   :  { %179 = vmatprep.subr.bf16.mxu1 %v535_v14 }
  0x19   :  { %499 = vmatpush3.bf16.msra.mxu0 %v548_v27 }
  0x1a   :  { %500 = vmatprep.subr.bf16.mxu0 %v549_v28 }
  0x1b   :  { %180 = vmatpush1.bf16.msra.mxu1 %v533_v15 }
  0x1c   :  { %181 = vmatprep.subr.bf16.mxu1 %v538_v16 }
  0x1d   :  { %501 = vmatpush3.bf16.msra.mxu0 %v550_v29 }
  0x1e   :  { %502 = vmatprep.subr.bf16.mxu0 %v551_v30 }
  0x1f   :  { %182 = vmatpush1.bf16.msra.mxu1 %v536_v17 }
  0x21   :  { %503 = vmatpush3.bf16.msra.mxu0 %v552_v31 }
  0x22   :  { %465 = vmatmul.mubr.msk.bf16.vlgmr.msra.gmra.mrb[4].mxu1 %vm22_vm0, %v526_v10  ;;  %504 = vmatprep.subr.bf16.mxu0 %v553_v32  ;;  %v251_v10 = vld [vmem:[#allocation2 + $0x8] sm:$0xff] }
  0x25   :  { %505 = vmatpush3.bf16.msra.mxu0 %v554_v33 }
  0xe5   :  { %v118_v34 = vpop.f32.mrb[0].mxu1 }
  0xe6   :  { %v466_v35 = vmul.f32 -1.442695, %v118_v34  ;;  %v120_v36 = vpop.f32.mrb[1].mxu1 }
  0xe7   :  { %v467_v37 = vmul.f32 -1.442695, %v120_v36  ;;  %v122_v38 = vpop.f32.mrb[2].mxu1 }
  0xe8   :  { %555 = vpow2.f32 %v466_v35  ;;  %v468_v39 = vmul.f32 -1.442695, %v122_v38  ;;  %v124_v40 = vpop.f32.mrb[3].mxu1 }
  0xe9   :  { %557 = vpow2.f32 %v467_v37  ;;  %v469_v41 = vmul.f32 -1.442695, %v124_v40 }
  0xea   :  { %559 = vpow2.f32 %v468_v39 }
  0xeb   :  { %561 = vpow2.f32 %v469_v41 }
  0xf2   :  { %v556_v42 = vpop.eup %555 }
  0xf3   :  { %v558_v43 = vpop.eup %557  ;;  %v230_v44 = vadd.f32 1.0, %v556_v42 }
  0xf4   :  { %v560_v45 = vpop.eup %559  ;;  %v231_v46 = vadd.f32 1.0, %v558_v43 }
  0xf5   :  { %v562_v47 = vpop.eup %561  ;;  %563 = vrcp.f32 %v230_v44  ;;  %v232_v48 = vadd.f32 1.0, %v560_v45  ;;  %v209_v49 = vpop.f32.mrb[4].mxu1 }
  0xf6   :  { %565 = vrcp.f32 %v231_v46  ;;  %v233_v50 = vadd.f32 1.0, %v562_v47  ;;  %v211_v51 = vpop.f32.mrb[5].mxu1 }
  0xf7   :  { %567 = vrcp.f32 %v232_v48  ;;  %v213_v52 = vpop.f32.mrb[6].mxu1 }
  0xf8   :  { %569 = vrcp.f32 %v233_v50  ;;  %v215_v53 = vpop.f32.mrb[7].mxu1 }
  0xff   :  { %v564_v54 = vpop.eup %563 }
 0x100   :  { %v566_v55 = vpop.eup %565  ;;  %v242_v56 = vmul.f32 %v564_v54, %v118_v34 }
 0x101   :  { %v568_v57 = vpop.eup %567  ;;  %v243_v58 = vmul.f32 %v566_v55, %v120_v36 }
 0x102   :  { %v570_v59 = vpop.eup %569  ;;  %v244_v60 = vmul.f32 %v568_v57, %v122_v38  ;;  %v246_v61 = vmul.f32 %v242_v56, %v209_v49 }
 0x103   :  { %v245_v62 = vmul.f32 %v570_v59, %v124_v40  ;;  %v247_v63 = vmul.f32 %v243_v58, %v211_v51 }
 0x104   :  { %v248_v0 = vmul.f32 %v244_v60, %v213_v52 }
 0x105   :  { %v249_v1 = vmul.f32 %v245_v62, %v215_v53 }
 0x106   :  { %v252_v2 = vpack.c.bf16 %v248_v0, %v246_v61 }
 0x107   :  { %v253_v3 = vpack.c.bf16 %v249_v1, %v247_v63 }
 0x109   :  { %414 = vmatprep.mubr.bf16.mxu0 %v253_v3 }
 0x10a   :  { %415 = vmatmul.mubr.bf16.vlgmr.msra.gmra.mrb[0].mxu0 %v252_v2 }
 0x1dd   :  { %v506_v5 = vpop.f32.mrb[0].mxu0 }
 0x1de   :  { %v507_v7 = vpop.f32.mrb[1].mxu0 }
 0x1df   :  { %v508_v8 = vadd.f32 %v507_v7, %v506_v5  ;;  %v509_v9 = vpop.f32.mrb[2].mxu0 }
 0x1e0   :  { %v510_v11 = vpop.f32.mrb[3].mxu0 }
 0x1e1   :  { %v423_v12 = vadd.f32 %v508_v8, %v250_v6  ;;  %v511_v13 = vadd.f32 %v510_v11, %v509_v9 }
 0x1e3   :  { %425 = vst.msk [vmem:[#allocation2] sm:$0xff] %vm22_vm0, %v423_v12  ;;  %v424_v14 = vadd.f32 %v511_v13, %v251_v10 }
 0x1e5   :  { %426 = vst.msk [vmem:[#allocation2 + $0x8] sm:$0xff] %vm22_vm0, %v424_v14 }
 0x1ea   :  { %v430_v15 = vld [vmem:[#allocation2] sm:$0xff] }
 0x1eb   :  { %v488_v16 = vpack.c.bf16 %v430_v15, %v430_v15 }
 0x1ec   :  { %v431_v17 = vld [vmem:[#allocation2 + $0x8] sm:$0xff] }
 0x1ed   :  { %441 = vst.msk [vmem:[%s713_s4] sm:$0xf] %vm440_vm1, %v488_v16  ;;  %v489_v18 = vpack.c.bf16 %v431_v17, %v431_v17 }
 0x1ef   :  { %442 = vst.msk [vmem:[%s713_s4 + $0x4] sm:$0xf] %vm440_vm1, %v489_v18 }

// kernel: run.27
= control target key start
LH: loop header
LB: loop body
LE: loop exit
PB: predicated region body
PF: predicated region fallthrough
CT: control target
= control target key end

     0   :  { %v191_v1 = vmov 0.0   ;;  %vm192_vm0 = vmmov 0   ;;  %vm17_vm1 = vcmask 785408   ;;  %s244_s0 = inlined_call_operand.vmem [shape: bf16[16,64], index: 0, kind: input, shape index: {}]   ;;  %s245_s1 = inlined_call_operand.vmem [shape: bf16[64,96], index: 1, kind: input, shape index: {}]   ;;  %s246_s2 = inlined_call_operand.hbm [shape: f32[16,96], index: 2, kind: output, shape index: {}]  }
   0x1   :  { %v162_v0 = vld [vmem:[%s245_s1] sm:$0xff]   ;;  %145 = vmatprep.subr.bf16.mxu0 %v191_v1  ;;  %v163_v2 = vld [vmem:[%s245_s1 + $0x8] sm:$0xff]   ;;  %153 = vmatprep.mubr.msk.bf16.mxu0 %vm192_vm0, %v191_v1  ;;  %18 = vst.msk [vmem:[#allocation2] sm:$0xff] %vm17_vm1, %v191_v1  ;;  %19 = vst.msk [vmem:[#allocation2 + $0x8] sm:$0xff] %vm17_vm1, %v191_v1 }
   0x2   :  { %146 = vmatpush3.bf16.msra.mxu0 %v162_v0 }
   0x3   :  { %147 = vmatprep.subr.bf16.mxu0 %v191_v1 }
   0x4   :  { %7 = vsyncpa [#allocation4], 0  ;;  %v164_v3 = vld [vmem:[%s245_s1 + $0x10] sm:$0xff]   ;;  %v165_v4 = vld [vmem:[%s245_s1 + $0x18] sm:$0xff]   ;;  %vm61_vm2 = vcmask 523264   ;;  %s193_s1 = smov [#allocation3]  }
   0x5   :  { %v166_v5 = vld [vmem:[%s244_s0] sm:$0xff]   ;;  %s123_s19 = sshll.u32 %s193_s1, 4  ;;  %s124_s19 = int_to_ptr.vmem [resolvable:$true] %s123_s19 }
   0x6   :  { %148 = vmatpush3.bf16.msra.mxu0 %v163_v2  ;;  %s167_s0 = scalar_lea.vmem %s124_s19, 256  ;;  %p172_p1 = scmp.lt.s32.totalorder %s124_s19, %s124_s19 }
   0x7   :  { %149 = vmatprep.subr.bf16.mxu0 %v191_v1  ;;  %p168_p0 = scmp.ne.s32.totalorder %s124_s19, %s167_s0  ;;  %p173_p2 = scmp.lt.s32.totalorder %s167_s0, %s167_s0 }
   0x8   :  { %v20_v6 = vld [vmem:[#allocation2] sm:$0xff]  ;;  %v21_v8 = vld [vmem:[#allocation2 + $0x8] sm:$0xff] }
   0x9   :  { %p174_p3 = por %p173_p2, %p172_p1 }
   0xa   :  { %150 = vmatpush3.bf16.msra.mxu0 %v164_v3 }
   0xb   :  { %151 = vmatprep.subr.bf16.mxu0 %v191_v1  ;;  %p175_p4 = pnand %p174_p3, %p168_p0 }
   0xe   :  { %152 = vmatpush3.bf16.msra.mxu0 %v165_v4 }
  0x11   :  { %154 = vmatmul.mubr.msk.bf16.vlgmr.msra.gmra.mrb[0].mxu0 %vm61_vm2, %v166_v5 }
  0xe4   :  { %v99_v7 = vpop.f32.mrb[0].mxu0 }
  0xe5   :  { %v106_v9 = vadd.f32 %v99_v7, %v20_v6  ;;  %v155_v10 = vpop.f32.mrb[1].mxu0 }
  0xe6   :  { %v102_v11 = vpop.f32.mrb[2].mxu0 }
  0xe7   :  { %109 = vst.msk [vmem:[#allocation2] sm:$0xff] %vm17_vm1, %v106_v9  ;;  %v107_v12 = vadd.f32 %v102_v11, %v21_v8  ;;  %v156_v13 = vpop.f32.mrb[3].mxu0 }
  0xe9   :  { %110 = vst.msk [vmem:[#allocation2 + $0x8] sm:$0xff] %vm17_vm1, %v107_v12 }
  0xee   :  { %v114_v14 = vld [vmem:[#allocation2] sm:$0xff] }
  0xef   :  { %116 = vst.msk [vmem:[#allocation3] sm:$0xff] %vm17_vm1, %v114_v14 }
  0xf0   :  { %v115_v15 = vld [vmem:[#allocation2 + $0x8] sm:$0xff] }
  0xf1   :  { %117 = vst.msk [vmem:[#allocation3 + $0x8] sm:$0xff] %vm17_vm1, %v115_v15 }
  0xf2   :  { %178 = shalt.err (!%p175_p4)
}
  0xf3   :  { %s179_s22 = scalar_lea.hbm %s246_s2, 256 }
  0xf4   :  { %p180_p5 = scmp.ne.s32.totalorder %s246_s2, %s179_s22  ;;  %p183_p6 = scmp.lt.u32.totalorder %s179_s22, %s246_s2 }
  0xf6   :  { %p185_p7 = pnand %p183_p6, %p180_p5 }
  0xf8   :  { %188 = shalt.err (!%p185_p7)
}
  0xf9   :  { %s194_s27 = smov 128   ;;  %s195_s28 = smov 8  }
  0xfa   :  { %129 = dma.vmem_to_hbm [thread:$0]  %s124_s19, 256, %s246_s2, [#allocation4], %s194_s27, %s194_s27, %s195_s28  }
  0xfb   :  { %189 = dma.done.wait [#allocation4], 256  }
  0xfc   :  { %190 = vsyncadd [#allocation4], 4294967040 }
  0xfd   :  { %133 = vsyncpa [#allocation4], 1 }

</bundles_post_ra>
